<compile_context>
chip_gen: v7x
topology: tpu7x:2x2x1
jax: 0.10.0
libtpu: 0.0.40
codegen_flags: <defaults>
</compile_context>

<pallas_src>
import numpy as np
import jax
import jax.numpy as jnp
from jax.experimental import pallas as pl
from jax.experimental.pallas import tpu as pltpu

# ----------------------------- model config ---------------------------------
IN_DIM = 8
OUT_DIM = 16
NUM_LAYERS = 2          # fused kernel below is specialized to 2 layers
HIDDEN_DIM = 32
BATCH = 2
SEQ = 8
# rnn_type='LSTM', bidirectional=False, dropout=0 (module defaults)


# ------------------------- fused Pallas RNN kernel ---------------------------
def make_fused_rnn_kernel(B, T):
    """Build the fused 2-layer LSTM + Linear kernel, specialized to (B, T)."""

    def kernel(mask_ref, x_ref, wih0_ref, whh0_ref, b0_ref,
               wih1_ref, whh1_ref, b1_ref, wf_ref, bf_ref,
               y_ref, h2_sc):
        # mask_ref : (T*B, 1) f32   validity mask, time-major rows [t*B + b]
        # x_ref    : (T*B, D) bf16  time-major flattened input
        # wihX     : (D_in, 4H) bf16   input->gates (gate order i, f, g, o)
        # whhX     : (H, 4H)   bf16   hidden->gates
        # bX       : (1, 4H)   f32    b_ih + b_hh
        # wf, bf   : (H, OUT) bf16, (1, OUT) f32   final Linear
        # y_ref    : (T*B, OUT) f32   output (time-major, reshaped in wrapper)
        # h2_sc    : (T*B, H)  f32    layer-1 (top layer) hidden outputs
        H = whh0_ref.shape[0]
        bf16 = jnp.bfloat16

        mask = mask_ref[...]                     # loaded once, reused everywhere
        whh0 = whh0_ref[...]
        wih1 = wih1_ref[...]
        whh1 = whh1_ref[...]
        b1 = b1_ref[...]

        # ---- layer-0 input projection hoisted out of the recurrence:
        #      ONE (T*B, D) @ (D, 4H) bf16 matmul (+bias) for all timesteps.
        gx0 = jnp.dot(x_ref[...], wih0_ref[...],
                      preferred_element_type=jnp.float32) + b0_ref[...]

        def lstm_cell(gates, c_prev):
            # full-width (B, 4H) EUP transcendentals (f32 — v5e-safe)
            sig = jax.nn.sigmoid(gates)
            tnh = jnp.tanh(gates)
            i_g = sig[:, 0 * H:1 * H]
            f_g = sig[:, 1 * H:2 * H]
            g_g = tnh[:, 2 * H:3 * H]
            o_g = sig[:, 3 * H:4 * H]
            c_new = f_g * c_prev + i_g * g_g
            h_new = o_g * jnp.tanh(c_new)
            return h_new, c_new

        h0 = jnp.zeros((B, H), jnp.float32)
        c0 = jnp.zeros((B, H), jnp.float32)
        h1 = jnp.zeros((B, H), jnp.float32)
        c1 = jnp.zeros((B, H), jnp.float32)

        # Interleaved two-layer recurrence: layer-1 step t follows layer-0
        # step t, so layer-0 step t+1 can overlap layer-1 step t.
        for t in range(T):                       # static, fully unrolled (T=8)
            r0 = t * B                           # static row offset (contiguous)
            m_t = mask[r0:r0 + B, :]             # (B, 1) f32; 1.0 if t < len[b]

            # ----- layer 0, step t: only h0 @ Whh0 on the recurrent chain -----
            g0 = gx0[r0:r0 + B, :] + jnp.dot(
                h0.astype(bf16), whh0, preferred_element_type=jnp.float32)
            h0n, c0n = lstm_cell(g0, c0)
            # freeze h/c past each sequence length (m is exactly 0.0 / 1.0)
            c0 = c0 + m_t * (c0n - c0)
            h0 = h0 + m_t * (h0n - h0)

            # ----- layer 1, step t (interleaved); x-proj is off the chain -----
            g1 = (jnp.dot(h0.astype(bf16), wih1,
                          preferred_element_type=jnp.float32) + b1
                  + jnp.dot(h1.astype(bf16), whh1,
                            preferred_element_type=jnp.float32))
            h1n, c1n = lstm_cell(g1, c1)
            c1 = c1 + m_t * (c1n - c1)
            h1 = h1 + m_t * (h1n - h1)

            # contiguous 2-D slab store of the raw (frozen) hidden state;
            # padded rows are zeroed once after the loop
            h2_sc[r0:r0 + B, :] = h1

        # pad_packed semantics: zero outputs past each length (single masked mul)
        h2 = h2_sc[...] * mask                   # (T*B, H) * (T*B, 1)

        # final Linear on the padded (zeroed) rows: one batched matmul + store
        y = jnp.dot(h2.astype(bf16), wf_ref[...],
                    preferred_element_type=jnp.float32) + bf_ref[...]
        y_ref[...] = y.astype(y_ref.dtype)

    return kernel


# ------------------------------- forward -------------------------------------
def rnn_forward(x, x_lengths, params):
    """x: [B, T, in_dim] float32 (batch_first). x_lengths: host int array.

    Returns (y, x_lengths) with y: [B, max(x_lengths), out_dim], matching the
    PyTorch module's forward (pack_padded -> LSTM -> pad_packed -> Linear).
    """
    assert NUM_LAYERS == 2, "fused kernel is specialized to 2 LSTM layers"
    B, _, D = x.shape
    lengths = np.asarray(x_lengths)
    T = int(lengths.max())                       # pad_packed pads to max length
    H = HIDDEN_DIM
    OUT = params["wf"].shape[1]
    bf16 = jnp.bfloat16

    # wrapper-side layout plumbing (free XLA work, keeps the kernel reshape-free)
    x = x[:, :T, :]
    x_tm = jnp.transpose(x, (1, 0, 2)).reshape(T * B, D).astype(bf16)
    mask_np = (np.arange(T)[:, None] < lengths[None, :]).astype(np.float32)
    mask = jnp.asarray(mask_np.reshape(T * B, 1))

    cost = pl.CostEstimate(
        flops=int(2 * T * B * D * 4 * H          # hoisted layer-0 projection
                  + 6 * T * B * H * 4 * H        # 3 per-step (B,H)@(H,4H) dots
                  + 2 * T * B * H * OUT),        # final Linear
        transcendentals=int(18 * T * B * H),
        bytes_accessed=int(4 * T * B + 2 * T * B * D
                           + 2 * (D * 4 * H + 3 * H * 4 * H + H * OUT)
                           + 4 * (2 * 4 * H + OUT)
                           + 4 * T * B * OUT))

    vmem = pltpu.MemorySpace.VMEM
    y_tm = pl.pallas_call(
        make_fused_rnn_kernel(B, T),
        out_shape=jax.ShapeDtypeStruct((T * B, OUT), jnp.float32),
        in_specs=[pl.BlockSpec(memory_space=vmem)] * 10,
        out_specs=pl.BlockSpec(memory_space=vmem),
        scratch_shapes=[pltpu.VMEM((T * B, H), jnp.float32)],
        cost_estimate=cost,
    )(mask, x_tm,
      params["wih"][0].astype(bf16), params["whh"][0].astype(bf16), params["b"][0],
      params["wih"][1].astype(bf16), params["whh"][1].astype(bf16), params["b"][1],
      params["wf"].astype(bf16), params["bf"])

    # back to batch-first [B, T, OUT]
    y = jnp.transpose(y_tm.reshape(T, B, OUT), (1, 0, 2))
    return y, x_lengths


# --------------------------- pure-JAX reference -------------------------------
def rnn_forward_ref(x, x_lengths, params):
    t_max = int(np.max(np.asarray(x_lengths)))
    x = x[:, :t_max]
    B = x.shape[0]
    lens = jnp.asarray(np.asarray(x_lengths), jnp.int32)
    h_in = x
    for l in range(NUM_LAYERS):
        wih, whh, b = params["wih"][l], params["whh"][l], params["b"][l]
        H = whh.shape[0]

        def step(carry, inp, wih=wih, whh=whh, b=b, H=H):
            h, c = carry
            x_t, t = inp
            gates = x_t @ wih + h @ whh + b[0]
            i_g = jax.nn.sigmoid(gates[:, :H])
            f_g = jax.nn.sigmoid(gates[:, H:2 * H])
            g_g = jnp.tanh(gates[:, 2 * H:3 * H])
            o_g = jax.nn.sigmoid(gates[:, 3 * H:])
            c_new = f_g * c + i_g * g_g
            h_new = o_g * jnp.tanh(c_new)
            m = (t < lens)[:, None]
            c = jnp.where(m, c_new, c)
            h = jnp.where(m, h_new, h)
            return (h, c), jnp.where(m, h_new, 0.0)

        xs = jnp.transpose(h_in, (1, 0, 2))
        _, ys = jax.lax.scan(step,
                             (jnp.zeros((B, H), jnp.float32),
                              jnp.zeros((B, H), jnp.float32)),
                             (xs, jnp.arange(t_max)))
        h_in = jnp.transpose(ys, (1, 0, 2))
    y = h_in @ params["wf"] + params["bf"][0]
    return y, x_lengths


# ----------------------------- param init ------------------------------------
def init_params(key):
    """Deterministic init, uniform(-k, k) with k = 1/sqrt(hidden) like PyTorch."""
    k = 1.0 / np.sqrt(HIDDEN_DIM)
    params = {"wih": [], "whh": [], "b": []}
    for l in range(NUM_LAYERS):
        d_in = IN_DIM if l == 0 else HIDDEN_DIM
        key, k1, k2, k3, k4 = jax.random.split(key, 5)
        params["wih"].append(
            jax.random.uniform(k1, (d_in, 4 * HIDDEN_DIM), jnp.float32, -k, k))
        params["whh"].append(
            jax.random.uniform(k2, (HIDDEN_DIM, 4 * HIDDEN_DIM), jnp.float32, -k, k))
        b_ih = jax.random.uniform(k3, (1, 4 * HIDDEN_DIM), jnp.float32, -k, k)
        b_hh = jax.random.uniform(k4, (1, 4 * HIDDEN_DIM), jnp.float32, -k, k)
        params["b"].append(b_ih + b_hh)
    key, k5, k6 = jax.random.split(key, 3)
    kf = 1.0 / np.sqrt(HIDDEN_DIM)  # num_directions = 1
    params["wf"] = jax.random.uniform(k5, (HIDDEN_DIM, OUT_DIM), jnp.float32, -kf, kf)
    params["bf"] = jax.random.uniform(k6, (1, OUT_DIM), jnp.float32, -kf, kf)
    return params


# --------------------------------- main ---------------------------------------
if __name__ == "__main__":
    key = jax.random.PRNGKey(0)
    key, kx = jax.random.split(key)
    params = init_params(key)

    x = jax.random.normal(kx, (BATCH, SEQ, IN_DIM), jnp.float32)
    # pack_padded_sequence with enforce_sorted=True -> lengths sorted descending
    x_lengths = np.array([SEQ, SEQ - 3], dtype=np.int32)

    y, lens_out = rnn_forward(x, x_lengths, params)
    y = jax.block_until_ready(y)

    # f32 reference; kernel uses bf16 MXU operands (f32 accumulation), so the
    # tolerance is loosened accordingly.
    y_ref, _ = rnn_forward_ref(x, x_lengths, params)
    np.testing.assert_allclose(np.asarray(y), np.asarray(y_ref),
                               rtol=2e-2, atol=2e-2)

    assert y.shape == (BATCH, int(np.max(x_lengths)), OUT_DIM)
    print("KERNEL_OK")

    # TODO(synk): rnn_type='RNN'/'GRU' and bidirectional=True branches of the
    # PyTorch module are not implemented (module defaults LSTM/unidirectional
    # are what the forward uses here).
</pallas_src>

<mosaic_0001>
module attributes {stable_mosaic.version = 11 : i64} {
  func.func @kernel(%arg0: memref<16x1xf32, #tpu.memory_space<vmem>>, %arg1: memref<16x8xbf16, #tpu.memory_space<vmem>>, %arg2: memref<8x128xbf16, #tpu.memory_space<vmem>>, %arg3: memref<32x128xbf16, #tpu.memory_space<vmem>>, %arg4: memref<1x128xf32, #tpu.memory_space<vmem>>, %arg5: memref<32x128xbf16, #tpu.memory_space<vmem>>, %arg6: memref<32x128xbf16, #tpu.memory_space<vmem>>, %arg7: memref<1x128xf32, #tpu.memory_space<vmem>>, %arg8: memref<32x16xbf16, #tpu.memory_space<vmem>>, %arg9: memref<1x16xf32, #tpu.memory_space<vmem>>, %arg10: memref<16x16xf32, #tpu.memory_space<vmem>>, %arg11: memref<16x32xf32, #tpu.memory_space<vmem>>) attributes {dimension_semantics = [], scalar_prefetch = 0 : i64, scratch_operands = 1 : i64, tpu.core_type = #tpu.core_type<tc>} {
    %c0 = arith.constant 0 : index
    %c0_0 = arith.constant 0 : index
    %0 = vector.load %arg0[%c0, %c0_0] : memref<16x1xf32, #tpu.memory_space<vmem>>, vector<16x1xf32>
    %c0_1 = arith.constant 0 : index
    %c0_2 = arith.constant 0 : index
    %1 = vector.load %arg3[%c0_1, %c0_2] : memref<32x128xbf16, #tpu.memory_space<vmem>>, vector<32x128xbf16>
    %c0_3 = arith.constant 0 : index
    %c0_4 = arith.constant 0 : index
    %2 = vector.load %arg5[%c0_3, %c0_4] : memref<32x128xbf16, #tpu.memory_space<vmem>>, vector<32x128xbf16>
    %c0_5 = arith.constant 0 : index
    %c0_6 = arith.constant 0 : index
    %3 = vector.load %arg6[%c0_5, %c0_6] : memref<32x128xbf16, #tpu.memory_space<vmem>>, vector<32x128xbf16>
    %c0_7 = arith.constant 0 : index
    %c0_8 = arith.constant 0 : index
    %4 = vector.load %arg7[%c0_7, %c0_8] : memref<1x128xf32, #tpu.memory_space<vmem>>, vector<1x128xf32>
    %c0_9 = arith.constant 0 : index
    %c0_10 = arith.constant 0 : index
    %5 = vector.load %arg1[%c0_9, %c0_10] : memref<16x8xbf16, #tpu.memory_space<vmem>>, vector<16x8xbf16>
    %c0_11 = arith.constant 0 : index
    %c0_12 = arith.constant 0 : index
    %6 = vector.load %arg2[%c0_11, %c0_12] : memref<8x128xbf16, #tpu.memory_space<vmem>>, vector<8x128xbf16>
    %cst = arith.constant dense<0.000000e+00> : vector<16x128xf32>
    %7 = tpu.matmul %5, %6, %cst {dimension_numbers = #tpu.dot_dimension_numbers<[1], [0], [0], [1], [0, 0, 1, 1], [], []>} : vector<16x8xbf16>, vector<8x128xbf16>, vector<16x128xf32> -> vector<16x128xf32>
    %c0_13 = arith.constant 0 : index
    %c0_14 = arith.constant 0 : index
    %8 = vector.load %arg4[%c0_13, %c0_14] : memref<1x128xf32, #tpu.memory_space<vmem>>, vector<1x128xf32>
    %9 = vector.broadcast %8 : vector<1x128xf32> to vector<16x128xf32>
    %10 = arith.addf %7, %9 : vector<16x128xf32>
    %cst_15 = arith.constant 0.000000e+00 : f32
    %11 = vector.broadcast %cst_15 : f32 to vector<2x32xf32>
    %cst_16 = arith.constant 0.000000e+00 : f32
    %12 = vector.broadcast %cst_16 : f32 to vector<2x32xf32>
    %cst_17 = arith.constant 0.000000e+00 : f32
    %13 = vector.broadcast %cst_17 : f32 to vector<2x32xf32>
    %cst_18 = arith.constant 0.000000e+00 : f32
    %14 = vector.broadcast %cst_18 : f32 to vector<2x32xf32>
    %15 = vector.extract_strided_slice %0 {offsets = [0, 0], sizes = [2, 1], strides = [1, 1]} : vector<16x1xf32> to vector<2x1xf32>
    %16 = vector.extract_strided_slice %10 {offsets = [0, 0], sizes = [2, 128], strides = [1, 1]} : vector<16x128xf32> to vector<2x128xf32>
    %17 = arith.truncf %11 : vector<2x32xf32> to vector<2x32xbf16>
    %cst_19 = arith.constant dense<0.000000e+00> : vector<2x128xf32>
    %18 = tpu.matmul %17, %1, %cst_19 {dimension_numbers = #tpu.dot_dimension_numbers<[1], [0], [0], [1], [0, 0, 1, 1], [], []>} : vector<2x32xbf16>, vector<32x128xbf16>, vector<2x128xf32> -> vector<2x128xf32>
    %19 = arith.addf %16, %18 : vector<2x128xf32>
    %20 = arith.negf %19 : vector<2x128xf32>
    %21 = math.exp %20 : vector<2x128xf32>
    %cst_20 = arith.constant 1.000000e+00 : f32
    %22 = vector.broadcast %cst_20 : f32 to vector<2x128xf32>
    %23 = arith.addf %22, %21 : vector<2x128xf32>
    %24 = arith.divf %22, %23 : vector<2x128xf32>
    %25 = math.tanh %19 : vector<2x128xf32>
    %26 = vector.extract_strided_slice %24 {offsets = [0, 0], sizes = [2, 32], strides = [1, 1]} : vector<2x128xf32> to vector<2x32xf32>
    %27 = vector.extract_strided_slice %24 {offsets = [0, 32], sizes = [2, 32], strides = [1, 1]} : vector<2x128xf32> to vector<2x32xf32>
    %28 = vector.extract_strided_slice %25 {offsets = [0, 64], sizes = [2, 32], strides = [1, 1]} : vector<2x128xf32> to vector<2x32xf32>
    %29 = vector.extract_strided_slice %24 {offsets = [0, 96], sizes = [2, 32], strides = [1, 1]} : vector<2x128xf32> to vector<2x32xf32>
    %30 = arith.mulf %27, %12 : vector<2x32xf32>
    %31 = arith.mulf %26, %28 : vector<2x32xf32>
    %32 = arith.addf %30, %31 : vector<2x32xf32>
    %33 = math.tanh %32 : vector<2x32xf32>
    %34 = arith.mulf %29, %33 : vector<2x32xf32>
    %35 = arith.subf %32, %12 : vector<2x32xf32>
    %36 = vector.broadcast %15 : vector<2x1xf32> to vector<2x32xf32>
    %37 = arith.mulf %36, %35 : vector<2x32xf32>
    %38 = arith.addf %12, %37 : vector<2x32xf32>
    %39 = arith.subf %34, %11 : vector<2x32xf32>
    %40 = vector.broadcast %15 : vector<2x1xf32> to vector<2x32xf32>
    %41 = arith.mulf %40, %39 : vector<2x32xf32>
    %42 = arith.addf %11, %41 : vector<2x32xf32>
    %43 = arith.truncf %42 : vector<2x32xf32> to vector<2x32xbf16>
    %cst_21 = arith.constant dense<0.000000e+00> : vector<2x128xf32>
    %44 = tpu.matmul %43, %2, %cst_21 {dimension_numbers = #tpu.dot_dimension_numbers<[1], [0], [0], [1], [0, 0, 1, 1], [], []>} : vector<2x32xbf16>, vector<32x128xbf16>, vector<2x128xf32> -> vector<2x128xf32>
    %45 = vector.broadcast %4 : vector<1x128xf32> to vector<2x128xf32>
    %46 = arith.addf %44, %45 : vector<2x128xf32>
    %47 = arith.truncf %13 : vector<2x32xf32> to vector<2x32xbf16>
    %cst_22 = arith.constant dense<0.000000e+00> : vector<2x128xf32>
    %48 = tpu.matmul %47, %3, %cst_22 {dimension_numbers = #tpu.dot_dimension_numbers<[1], [0], [0], [1], [0, 0, 1, 1], [], []>} : vector<2x32xbf16>, vector<32x128xbf16>, vector<2x128xf32> -> vector<2x128xf32>
    %49 = arith.addf %46, %48 : vector<2x128xf32>
    %50 = arith.negf %49 : vector<2x128xf32>
    %51 = math.exp %50 : vector<2x128xf32>
    %cst_23 = arith.constant 1.000000e+00 : f32
    %52 = vector.broadcast %cst_23 : f32 to vector<2x128xf32>
    %53 = arith.addf %52, %51 : vector<2x128xf32>
    %54 = arith.divf %52, %53 : vector<2x128xf32>
    %55 = math.tanh %49 : vector<2x128xf32>
    %56 = vector.extract_strided_slice %54 {offsets = [0, 0], sizes = [2, 32], strides = [1, 1]} : vector<2x128xf32> to vector<2x32xf32>
    %57 = vector.extract_strided_slice %54 {offsets = [0, 32], sizes = [2, 32], strides = [1, 1]} : vector<2x128xf32> to vector<2x32xf32>
    %58 = vector.extract_strided_slice %55 {offsets = [0, 64], sizes = [2, 32], strides = [1, 1]} : vector<2x128xf32> to vector<2x32xf32>
    %59 = vector.extract_strided_slice %54 {offsets = [0, 96], sizes = [2, 32], strides = [1, 1]} : vector<2x128xf32> to vector<2x32xf32>
    %60 = arith.mulf %57, %14 : vector<2x32xf32>
    %61 = arith.mulf %56, %58 : vector<2x32xf32>
    %62 = arith.addf %60, %61 : vector<2x32xf32>
    %63 = math.tanh %62 : vector<2x32xf32>
    %64 = arith.mulf %59, %63 : vector<2x32xf32>
    %65 = arith.subf %62, %14 : vector<2x32xf32>
    %66 = vector.broadcast %15 : vector<2x1xf32> to vector<2x32xf32>
    %67 = arith.mulf %66, %65 : vector<2x32xf32>
    %68 = arith.addf %14, %67 : vector<2x32xf32>
    %69 = arith.subf %64, %13 : vector<2x32xf32>
    %70 = vector.broadcast %15 : vector<2x1xf32> to vector<2x32xf32>
    %71 = arith.mulf %70, %69 : vector<2x32xf32>
    %72 = arith.addf %13, %71 : vector<2x32xf32>
    %c0_24 = arith.constant 0 : index
    %c0_25 = arith.constant 0 : index
    %73 = vector.load %arg11[%c0_24, %c0_25] : memref<16x32xf32, #tpu.memory_space<vmem>>, vector<2x32xf32>
    tpu.vector_store %arg11[%c0_24, %c0_25], %72 {strides = array<i32>} : memref<16x32xf32, #tpu.memory_space<vmem>>, vector<2x32xf32>,
    %74 = vector.extract_strided_slice %0 {offsets = [2, 0], sizes = [2, 1], strides = [1, 1]} : vector<16x1xf32> to vector<2x1xf32>
    %75 = vector.extract_strided_slice %10 {offsets = [2, 0], sizes = [2, 128], strides = [1, 1]} : vector<16x128xf32> to vector<2x128xf32>
    %76 = arith.truncf %42 : vector<2x32xf32> to vector<2x32xbf16>
    %cst_26 = arith.constant dense<0.000000e+00> : vector<2x128xf32>
    %77 = tpu.matmul %76, %1, %cst_26 {dimension_numbers = #tpu.dot_dimension_numbers<[1], [0], [0], [1], [0, 0, 1, 1], [], []>} : vector<2x32xbf16>, vector<32x128xbf16>, vector<2x128xf32> -> vector<2x128xf32>
    %78 = arith.addf %75, %77 : vector<2x128xf32>
    %79 = arith.negf %78 : vector<2x128xf32>
    %80 = math.exp %79 : vector<2x128xf32>
    %cst_27 = arith.constant 1.000000e+00 : f32
    %81 = vector.broadcast %cst_27 : f32 to vector<2x128xf32>
    %82 = arith.addf %81, %80 : vector<2x128xf32>
    %83 = arith.divf %81, %82 : vector<2x128xf32>
    %84 = math.tanh %78 : vector<2x128xf32>
    %85 = vector.extract_strided_slice %83 {offsets = [0, 0], sizes = [2, 32], strides = [1, 1]} : vector<2x128xf32> to vector<2x32xf32>
    %86 = vector.extract_strided_slice %83 {offsets = [0, 32], sizes = [2, 32], strides = [1, 1]} : vector<2x128xf32> to vector<2x32xf32>
    %87 = vector.extract_strided_slice %84 {offsets = [0, 64], sizes = [2, 32], strides = [1, 1]} : vector<2x128xf32> to vector<2x32xf32>
    %88 = vector.extract_strided_slice %83 {offsets = [0, 96], sizes = [2, 32], strides = [1, 1]} : vector<2x128xf32> to vector<2x32xf32>
    %89 = arith.mulf %86, %38 : vector<2x32xf32>
    %90 = arith.mulf %85, %87 : vector<2x32xf32>
    %91 = arith.addf %89, %90 : vector<2x32xf32>
    %92 = math.tanh %91 : vector<2x32xf32>
    %93 = arith.mulf %88, %92 : vector<2x32xf32>
    %94 = arith.subf %91, %38 : vector<2x32xf32>
    %95 = vector.broadcast %74 : vector<2x1xf32> to vector<2x32xf32>
    %96 = arith.mulf %95, %94 : vector<2x32xf32>
    %97 = arith.addf %38, %96 : vector<2x32xf32>
    %98 = arith.subf %93, %42 : vector<2x32xf32>
    %99 = vector.broadcast %74 : vector<2x1xf32> to vector<2x32xf32>
    %100 = arith.mulf %99, %98 : vector<2x32xf32>
    %101 = arith.addf %42, %100 : vector<2x32xf32>
    %102 = arith.truncf %101 : vector<2x32xf32> to vector<2x32xbf16>
    %cst_28 = arith.constant dense<0.000000e+00> : vector<2x128xf32>
    %103 = tpu.matmul %102, %2, %cst_28 {dimension_numbers = #tpu.dot_dimension_numbers<[1], [0], [0], [1], [0, 0, 1, 1], [], []>} : vector<2x32xbf16>, vector<32x128xbf16>, vector<2x128xf32> -> vector<2x128xf32>
    %104 = vector.broadcast %4 : vector<1x128xf32> to vector<2x128xf32>
    %105 = arith.addf %103, %104 : vector<2x128xf32>
    %106 = arith.truncf %72 : vector<2x32xf32> to vector<2x32xbf16>
    %cst_29 = arith.constant dense<0.000000e+00> : vector<2x128xf32>
    %107 = tpu.matmul %106, %3, %cst_29 {dimension_numbers = #tpu.dot_dimension_numbers<[1], [0], [0], [1], [0, 0, 1, 1], [], []>} : vector<2x32xbf16>, vector<32x128xbf16>, vector<2x128xf32> -> vector<2x128xf32>
    %108 = arith.addf %105, %107 : vector<2x128xf32>
    %109 = arith.negf %108 : vector<2x128xf32>
    %110 = math.exp %109 : vector<2x128xf32>
    %cst_30 = arith.constant 1.000000e+00 : f32
    %111 = vector.broadcast %cst_30 : f32 to vector<2x128xf32>
    %112 = arith.addf %111, %110 : vector<2x128xf32>
    %113 = arith.divf %111, %112 : vector<2x128xf32>
    %114 = math.tanh %108 : vector<2x128xf32>
    %115 = vector.extract_strided_slice %113 {offsets = [0, 0], sizes = [2, 32], strides = [1, 1]} : vector<2x128xf32> to vector<2x32xf32>
    %116 = vector.extract_strided_slice %113 {offsets = [0, 32], sizes = [2, 32], strides = [1, 1]} : vector<2x128xf32> to vector<2x32xf32>
    %117 = vector.extract_strided_slice %114 {offsets = [0, 64], sizes = [2, 32], strides = [1, 1]} : vector<2x128xf32> to vector<2x32xf32>
    %118 = vector.extract_strided_slice %113 {offsets = [0, 96], sizes = [2, 32], strides = [1, 1]} : vector<2x128xf32> to vector<2x32xf32>
    %119 = arith.mulf %116, %68 : vector<2x32xf32>
    %120 = arith.mulf %115, %117 : vector<2x32xf32>
    %121 = arith.addf %119, %120 : vector<2x32xf32>
    %122 = math.tanh %121 : vector<2x32xf32>
    %123 = arith.mulf %118, %122 : vector<2x32xf32>
    %124 = arith.subf %121, %68 : vector<2x32xf32>
    %125 = vector.broadcast %74 : vector<2x1xf32> to vector<2x32xf32>
    %126 = arith.mulf %125, %124 : vector<2x32xf32>
    %127 = arith.addf %68, %126 : vector<2x32xf32>
    %128 = arith.subf %123, %72 : vector<2x32xf32>
    %129 = vector.broadcast %74 : vector<2x1xf32> to vector<2x32xf32>
    %130 = arith.mulf %129, %128 : vector<2x32xf32>
    %131 = arith.addf %72, %130 : vector<2x32xf32>
    %c2 = arith.constant 2 : index
    %c0_31 = arith.constant 0 : index
    %132 = vector.load %arg11[%c2, %c0_31] : memref<16x32xf32, #tpu.memory_space<vmem>>, vector<2x32xf32>
    tpu.vector_store %arg11[%c2, %c0_31], %131 {strides = array<i32>} : memref<16x32xf32, #tpu.memory_space<vmem>>, vector<2x32xf32>,
    %133 = vector.extract_strided_slice %0 {offsets = [4, 0], sizes = [2, 1], strides = [1, 1]} : vector<16x1xf32> to vector<2x1xf32>
    %134 = vector.extract_strided_slice %10 {offsets = [4, 0], sizes = [2, 128], strides = [1, 1]} : vector<16x128xf32> to vector<2x128xf32>
    %135 = arith.truncf %101 : vector<2x32xf32> to vector<2x32xbf16>
    %cst_32 = arith.constant dense<0.000000e+00> : vector<2x128xf32>
    %136 = tpu.matmul %135, %1, %cst_32 {dimension_numbers = #tpu.dot_dimension_numbers<[1], [0], [0], [1], [0, 0, 1, 1], [], []>} : vector<2x32xbf16>, vector<32x128xbf16>, vector<2x128xf32> -> vector<2x128xf32>
    %137 = arith.addf %134, %136 : vector<2x128xf32>
    %138 = arith.negf %137 : vector<2x128xf32>
    %139 = math.exp %138 : vector<2x128xf32>
    %cst_33 = arith.constant 1.000000e+00 : f32
    %140 = vector.broadcast %cst_33 : f32 to vector<2x128xf32>
    %141 = arith.addf %140, %139 : vector<2x128xf32>
    %142 = arith.divf %140, %141 : vector<2x128xf32>
    %143 = math.tanh %137 : vector<2x128xf32>
    %144 = vector.extract_strided_slice %142 {offsets = [0, 0], sizes = [2, 32], strides = [1, 1]} : vector<2x128xf32> to vector<2x32xf32>
    %145 = vector.extract_strided_slice %142 {offsets = [0, 32], sizes = [2, 32], strides = [1, 1]} : vector<2x128xf32> to vector<2x32xf32>
    %146 = vector.extract_strided_slice %143 {offsets = [0, 64], sizes = [2, 32], strides = [1, 1]} : vector<2x128xf32> to vector<2x32xf32>
    %147 = vector.extract_strided_slice %142 {offsets = [0, 96], sizes = [2, 32], strides = [1, 1]} : vector<2x128xf32> to vector<2x32xf32>
    %148 = arith.mulf %145, %97 : vector<2x32xf32>
    %149 = arith.mulf %144, %146 : vector<2x32xf32>
    %150 = arith.addf %148, %149 : vector<2x32xf32>
    %151 = math.tanh %150 : vector<2x32xf32>
    %152 = arith.mulf %147, %151 : vector<2x32xf32>
    %153 = arith.subf %150, %97 : vector<2x32xf32>
    %154 = vector.broadcast %133 : vector<2x1xf32> to vector<2x32xf32>
    %155 = arith.mulf %154, %153 : vector<2x32xf32>
    %156 = arith.addf %97, %155 : vector<2x32xf32>
    %157 = arith.subf %152, %101 : vector<2x32xf32>
    %158 = vector.broadcast %133 : vector<2x1xf32> to vector<2x32xf32>
    %159 = arith.mulf %158, %157 : vector<2x32xf32>
    %160 = arith.addf %101, %159 : vector<2x32xf32>
    %161 = arith.truncf %160 : vector<2x32xf32> to vector<2x32xbf16>
    %cst_34 = arith.constant dense<0.000000e+00> : vector<2x128xf32>
    %162 = tpu.matmul %161, %2, %cst_34 {dimension_numbers = #tpu.dot_dimension_numbers<[1], [0], [0], [1], [0, 0, 1, 1], [], []>} : vector<2x32xbf16>, vector<32x128xbf16>, vector<2x128xf32> -> vector<2x128xf32>
    %163 = vector.broadcast %4 : vector<1x128xf32> to vector<2x128xf32>
    %164 = arith.addf %162, %163 : vector<2x128xf32>
    %165 = arith.truncf %131 : vector<2x32xf32> to vector<2x32xbf16>
    %cst_35 = arith.constant dense<0.000000e+00> : vector<2x128xf32>
    %166 = tpu.matmul %165, %3, %cst_35 {dimension_numbers = #tpu.dot_dimension_numbers<[1], [0], [0], [1], [0, 0, 1, 1], [], []>} : vector<2x32xbf16>, vector<32x128xbf16>, vector<2x128xf32> -> vector<2x128xf32>
    %167 = arith.addf %164, %166 : vector<2x128xf32>
    %168 = arith.negf %167 : vector<2x128xf32>
    %169 = math.exp %168 : vector<2x128xf32>
    %cst_36 = arith.constant 1.000000e+00 : f32
    %170 = vector.broadcast %cst_36 : f32 to vector<2x128xf32>
    %171 = arith.addf %170, %169 : vector<2x128xf32>
    %172 = arith.divf %170, %171 : vector<2x128xf32>
    %173 = math.tanh %167 : vector<2x128xf32>
    %174 = vector.extract_strided_slice %172 {offsets = [0, 0], sizes = [2, 32], strides = [1, 1]} : vector<2x128xf32> to vector<2x32xf32>
    %175 = vector.extract_strided_slice %172 {offsets = [0, 32], sizes = [2, 32], strides = [1, 1]} : vector<2x128xf32> to vector<2x32xf32>
    %176 = vector.extract_strided_slice %173 {offsets = [0, 64], sizes = [2, 32], strides = [1, 1]} : vector<2x128xf32> to vector<2x32xf32>
    %177 = vector.extract_strided_slice %172 {offsets = [0, 96], sizes = [2, 32], strides = [1, 1]} : vector<2x128xf32> to vector<2x32xf32>
    %178 = arith.mulf %175, %127 : vector<2x32xf32>
    %179 = arith.mulf %174, %176 : vector<2x32xf32>
    %180 = arith.addf %178, %179 : vector<2x32xf32>
    %181 = math.tanh %180 : vector<2x32xf32>
    %182 = arith.mulf %177, %181 : vector<2x32xf32>
    %183 = arith.subf %180, %127 : vector<2x32xf32>
    %184 = vector.broadcast %133 : vector<2x1xf32> to vector<2x32xf32>
    %185 = arith.mulf %184, %183 : vector<2x32xf32>
    %186 = arith.addf %127, %185 : vector<2x32xf32>
    %187 = arith.subf %182, %131 : vector<2x32xf32>
    %188 = vector.broadcast %133 : vector<2x1xf32> to vector<2x32xf32>
    %189 = arith.mulf %188, %187 : vector<2x32xf32>
    %190 = arith.addf %131, %189 : vector<2x32xf32>
    %c4 = arith.constant 4 : index
    %c0_37 = arith.constant 0 : index
    %191 = vector.load %arg11[%c4, %c0_37] : memref<16x32xf32, #tpu.memory_space<vmem>>, vector<2x32xf32>
    tpu.vector_store %arg11[%c4, %c0_37], %190 {strides = array<i32>} : memref<16x32xf32, #tpu.memory_space<vmem>>, vector<2x32xf32>,
    %192 = vector.extract_strided_slice %0 {offsets = [6, 0], sizes = [2, 1], strides = [1, 1]} : vector<16x1xf32> to vector<2x1xf32>
    %193 = vector.extract_strided_slice %10 {offsets = [6, 0], sizes = [2, 128], strides = [1, 1]} : vector<16x128xf32> to vector<2x128xf32>
    %194 = arith.truncf %160 : vector<2x32xf32> to vector<2x32xbf16>
    %cst_38 = arith.constant dense<0.000000e+00> : vector<2x128xf32>
    %195 = tpu.matmul %194, %1, %cst_38 {dimension_numbers = #tpu.dot_dimension_numbers<[1], [0], [0], [1], [0, 0, 1, 1], [], []>} : vector<2x32xbf16>, vector<32x128xbf16>, vector<2x128xf32> -> vector<2x128xf32>
    %196 = arith.addf %193, %195 : vector<2x128xf32>
    %197 = arith.negf %196 : vector<2x128xf32>
    %198 = math.exp %197 : vector<2x128xf32>
    %cst_39 = arith.constant 1.000000e+00 : f32
    %199 = vector.broadcast %cst_39 : f32 to vector<2x128xf32>
    %200 = arith.addf %199, %198 : vector<2x128xf32>
    %201 = arith.divf %199, %200 : vector<2x128xf32>
    %202 = math.tanh %196 : vector<2x128xf32>
    %203 = vector.extract_strided_slice %201 {offsets = [0, 0], sizes = [2, 32], strides = [1, 1]} : vector<2x128xf32> to vector<2x32xf32>
    %204 = vector.extract_strided_slice %201 {offsets = [0, 32], sizes = [2, 32], strides = [1, 1]} : vector<2x128xf32> to vector<2x32xf32>
    %205 = vector.extract_strided_slice %202 {offsets = [0, 64], sizes = [2, 32], strides = [1, 1]} : vector<2x128xf32> to vector<2x32xf32>
    %206 = vector.extract_strided_slice %201 {offsets = [0, 96], sizes = [2, 32], strides = [1, 1]} : vector<2x128xf32> to vector<2x32xf32>
    %207 = arith.mulf %204, %156 : vector<2x32xf32>
    %208 = arith.mulf %203, %205 : vector<2x32xf32>
    %209 = arith.addf %207, %208 : vector<2x32xf32>
    %210 = math.tanh %209 : vector<2x32xf32>
    %211 = arith.mulf %206, %210 : vector<2x32xf32>
    %212 = arith.subf %209, %156 : vector<2x32xf32>
    %213 = vector.broadcast %192 : vector<2x1xf32> to vector<2x32xf32>
    %214 = arith.mulf %213, %212 : vector<2x32xf32>
    %215 = arith.addf %156, %214 : vector<2x32xf32>
    %216 = arith.subf %211, %160 : vector<2x32xf32>
    %217 = vector.broadcast %192 : vector<2x1xf32> to vector<2x32xf32>
    %218 = arith.mulf %217, %216 : vector<2x32xf32>
    %219 = arith.addf %160, %218 : vector<2x32xf32>
    %220 = arith.truncf %219 : vector<2x32xf32> to vector<2x32xbf16>
    %cst_40 = arith.constant dense<0.000000e+00> : vector<2x128xf32>
    %221 = tpu.matmul %220, %2, %cst_40 {dimension_numbers = #tpu.dot_dimension_numbers<[1], [0], [0], [1], [0, 0, 1, 1], [], []>} : vector<2x32xbf16>, vector<32x128xbf16>, vector<2x128xf32> -> vector<2x128xf32>
    %222 = vector.broadcast %4 : vector<1x128xf32> to vector<2x128xf32>
    %223 = arith.addf %221, %222 : vector<2x128xf32>
    %224 = arith.truncf %190 : vector<2x32xf32> to vector<2x32xbf16>
    %cst_41 = arith.constant dense<0.000000e+00> : vector<2x128xf32>
    %225 = tpu.matmul %224, %3, %cst_41 {dimension_numbers = #tpu.dot_dimension_numbers<[1], [0], [0], [1], [0, 0, 1, 1], [], []>} : vector<2x32xbf16>, vector<32x128xbf16>, vector<2x128xf32> -> vector<2x128xf32>
    %226 = arith.addf %223, %225 : vector<2x128xf32>
    %227 = arith.negf %226 : vector<2x128xf32>
    %228 = math.exp %227 : vector<2x128xf32>
    %cst_42 = arith.constant 1.000000e+00 : f32
    %229 = vector.broadcast %cst_42 : f32 to vector<2x128xf32>
    %230 = arith.addf %229, %228 : vector<2x128xf32>
    %231 = arith.divf %229, %230 : vector<2x128xf32>
    %232 = math.tanh %226 : vector<2x128xf32>
    %233 = vector.extract_strided_slice %231 {offsets = [0, 0], sizes = [2, 32], strides = [1, 1]} : vector<2x128xf32> to vector<2x32xf32>
    %234 = vector.extract_strided_slice %231 {offsets = [0, 32], sizes = [2, 32], strides = [1, 1]} : vector<2x128xf32> to vector<2x32xf32>
    %235 = vector.extract_strided_slice %232 {offsets = [0, 64], sizes = [2, 32], strides = [1, 1]} : vector<2x128xf32> to vector<2x32xf32>
    %236 = vector.extract_strided_slice %231 {offsets = [0, 96], sizes = [2, 32], strides = [1, 1]} : vector<2x128xf32> to vector<2x32xf32>
    %237 = arith.mulf %234, %186 : vector<2x32xf32>
    %238 = arith.mulf %233, %235 : vector<2x32xf32>
    %239 = arith.addf %237, %238 : vector<2x32xf32>
    %240 = math.tanh %239 : vector<2x32xf32>
    %241 = arith.mulf %236, %240 : vector<2x32xf32>
    %242 = arith.subf %239, %186 : vector<2x32xf32>
    %243 = vector.broadcast %192 : vector<2x1xf32> to vector<2x32xf32>
    %244 = arith.mulf %243, %242 : vector<2x32xf32>
    %245 = arith.addf %186, %244 : vector<2x32xf32>
    %246 = arith.subf %241, %190 : vector<2x32xf32>
    %247 = vector.broadcast %192 : vector<2x1xf32> to vector<2x32xf32>
    %248 = arith.mulf %247, %246 : vector<2x32xf32>
    %249 = arith.addf %190, %248 : vector<2x32xf32>
    %c6 = arith.constant 6 : index
    %c0_43 = arith.constant 0 : index
    %250 = vector.load %arg11[%c6, %c0_43] : memref<16x32xf32, #tpu.memory_space<vmem>>, vector<2x32xf32>
    tpu.vector_store %arg11[%c6, %c0_43], %249 {strides = array<i32>} : memref<16x32xf32, #tpu.memory_space<vmem>>, vector<2x32xf32>,
    %251 = vector.extract_strided_slice %0 {offsets = [8, 0], sizes = [2, 1], strides = [1, 1]} : vector<16x1xf32> to vector<2x1xf32>
    %252 = vector.extract_strided_slice %10 {offsets = [8, 0], sizes = [2, 128], strides = [1, 1]} : vector<16x128xf32> to vector<2x128xf32>
    %253 = arith.truncf %219 : vector<2x32xf32> to vector<2x32xbf16>
    %cst_44 = arith.constant dense<0.000000e+00> : vector<2x128xf32>
    %254 = tpu.matmul %253, %1, %cst_44 {dimension_numbers = #tpu.dot_dimension_numbers<[1], [0], [0], [1], [0, 0, 1, 1], [], []>} : vector<2x32xbf16>, vector<32x128xbf16>, vector<2x128xf32> -> vector<2x128xf32>
    %255 = arith.addf %252, %254 : vector<2x128xf32>
    %256 = arith.negf %255 : vector<2x128xf32>
    %257 = math.exp %256 : vector<2x128xf32>
    %cst_45 = arith.constant 1.000000e+00 : f32
    %258 = vector.broadcast %cst_45 : f32 to vector<2x128xf32>
    %259 = arith.addf %258, %257 : vector<2x128xf32>
    %260 = arith.divf %258, %259 : vector<2x128xf32>
    %261 = math.tanh %255 : vector<2x128xf32>
    %262 = vector.extract_strided_slice %260 {offsets = [0, 0], sizes = [2, 32], strides = [1, 1]} : vector<2x128xf32> to vector<2x32xf32>
    %263 = vector.extract_strided_slice %260 {offsets = [0, 32], sizes = [2, 32], strides = [1, 1]} : vector<2x128xf32> to vector<2x32xf32>
    %264 = vector.extract_strided_slice %261 {offsets = [0, 64], sizes = [2, 32], strides = [1, 1]} : vector<2x128xf32> to vector<2x32xf32>
    %265 = vector.extract_strided_slice %260 {offsets = [0, 96], sizes = [2, 32], strides = [1, 1]} : vector<2x128xf32> to vector<2x32xf32>
    %266 = arith.mulf %263, %215 : vector<2x32xf32>
    %267 = arith.mulf %262, %264 : vector<2x32xf32>
    %268 = arith.addf %266, %267 : vector<2x32xf32>
    %269 = math.tanh %268 : vector<2x32xf32>
    %270 = arith.mulf %265, %269 : vector<2x32xf32>
    %271 = arith.subf %268, %215 : vector<2x32xf32>
    %272 = vector.broadcast %251 : vector<2x1xf32> to vector<2x32xf32>
    %273 = arith.mulf %272, %271 : vector<2x32xf32>
    %274 = arith.addf %215, %273 : vector<2x32xf32>
    %275 = arith.subf %270, %219 : vector<2x32xf32>
    %276 = vector.broadcast %251 : vector<2x1xf32> to vector<2x32xf32>
    %277 = arith.mulf %276, %275 : vector<2x32xf32>
    %278 = arith.addf %219, %277 : vector<2x32xf32>
    %279 = arith.truncf %278 : vector<2x32xf32> to vector<2x32xbf16>
    %cst_46 = arith.constant dense<0.000000e+00> : vector<2x128xf32>
    %280 = tpu.matmul %279, %2, %cst_46 {dimension_numbers = #tpu.dot_dimension_numbers<[1], [0], [0], [1], [0, 0, 1, 1], [], []>} : vector<2x32xbf16>, vector<32x128xbf16>, vector<2x128xf32> -> vector<2x128xf32>
    %281 = vector.broadcast %4 : vector<1x128xf32> to vector<2x128xf32>
    %282 = arith.addf %280, %281 : vector<2x128xf32>
    %283 = arith.truncf %249 : vector<2x32xf32> to vector<2x32xbf16>
    %cst_47 = arith.constant dense<0.000000e+00> : vector<2x128xf32>
    %284 = tpu.matmul %283, %3, %cst_47 {dimension_numbers = #tpu.dot_dimension_numbers<[1], [0], [0], [1], [0, 0, 1, 1], [], []>} : vector<2x32xbf16>, vector<32x128xbf16>, vector<2x128xf32> -> vector<2x128xf32>
    %285 = arith.addf %282, %284 : vector<2x128xf32>
    %286 = arith.negf %285 : vector<2x128xf32>
    %287 = math.exp %286 : vector<2x128xf32>
    %cst_48 = arith.constant 1.000000e+00 : f32
    %288 = vector.broadcast %cst_48 : f32 to vector<2x128xf32>
    %289 = arith.addf %288, %287 : vector<2x128xf32>
    %290 = arith.divf %288, %289 : vector<2x128xf32>
    %291 = math.tanh %285 : vector<2x128xf32>
    %292 = vector.extract_strided_slice %290 {offsets = [0, 0], sizes = [2, 32], strides = [1, 1]} : vector<2x128xf32> to vector<2x32xf32>
    %293 = vector.extract_strided_slice %290 {offsets = [0, 32], sizes = [2, 32], strides = [1, 1]} : vector<2x128xf32> to vector<2x32xf32>
    %294 = vector.extract_strided_slice %291 {offsets = [0, 64], sizes = [2, 32], strides = [1, 1]} : vector<2x128xf32> to vector<2x32xf32>
    %295 = vector.extract_strided_slice %290 {offsets = [0, 96], sizes = [2, 32], strides = [1, 1]} : vector<2x128xf32> to vector<2x32xf32>
    %296 = arith.mulf %293, %245 : vector<2x32xf32>
    %297 = arith.mulf %292, %294 : vector<2x32xf32>
    %298 = arith.addf %296, %297 : vector<2x32xf32>
    %299 = math.tanh %298 : vector<2x32xf32>
    %300 = arith.mulf %295, %299 : vector<2x32xf32>
    %301 = arith.subf %298, %245 : vector<2x32xf32>
    %302 = vector.broadcast %251 : vector<2x1xf32> to vector<2x32xf32>
    %303 = arith.mulf %302, %301 : vector<2x32xf32>
    %304 = arith.addf %245, %303 : vector<2x32xf32>
    %305 = arith.subf %300, %249 : vector<2x32xf32>
    %306 = vector.broadcast %251 : vector<2x1xf32> to vector<2x32xf32>
    %307 = arith.mulf %306, %305 : vector<2x32xf32>
    %308 = arith.addf %249, %307 : vector<2x32xf32>
    %c8 = arith.constant 8 : index
    %c0_49 = arith.constant 0 : index
    %309 = vector.load %arg11[%c8, %c0_49] : memref<16x32xf32, #tpu.memory_space<vmem>>, vector<2x32xf32>
    tpu.vector_store %arg11[%c8, %c0_49], %308 {strides = array<i32>} : memref<16x32xf32, #tpu.memory_space<vmem>>, vector<2x32xf32>,
    %310 = vector.extract_strided_slice %0 {offsets = [10, 0], sizes = [2, 1], strides = [1, 1]} : vector<16x1xf32> to vector<2x1xf32>
    %311 = vector.extract_strided_slice %10 {offsets = [10, 0], sizes = [2, 128], strides = [1, 1]} : vector<16x128xf32> to vector<2x128xf32>
    %312 = arith.truncf %278 : vector<2x32xf32> to vector<2x32xbf16>
    %cst_50 = arith.constant dense<0.000000e+00> : vector<2x128xf32>
    %313 = tpu.matmul %312, %1, %cst_50 {dimension_numbers = #tpu.dot_dimension_numbers<[1], [0], [0], [1], [0, 0, 1, 1], [], []>} : vector<2x32xbf16>, vector<32x128xbf16>, vector<2x128xf32> -> vector<2x128xf32>
    %314 = arith.addf %311, %313 : vector<2x128xf32>
    %315 = arith.negf %314 : vector<2x128xf32>
    %316 = math.exp %315 : vector<2x128xf32>
    %cst_51 = arith.constant 1.000000e+00 : f32
    %317 = vector.broadcast %cst_51 : f32 to vector<2x128xf32>
    %318 = arith.addf %317, %316 : vector<2x128xf32>
    %319 = arith.divf %317, %318 : vector<2x128xf32>
    %320 = math.tanh %314 : vector<2x128xf32>
    %321 = vector.extract_strided_slice %319 {offsets = [0, 0], sizes = [2, 32], strides = [1, 1]} : vector<2x128xf32> to vector<2x32xf32>
    %322 = vector.extract_strided_slice %319 {offsets = [0, 32], sizes = [2, 32], strides = [1, 1]} : vector<2x128xf32> to vector<2x32xf32>
    %323 = vector.extract_strided_slice %320 {offsets = [0, 64], sizes = [2, 32], strides = [1, 1]} : vector<2x128xf32> to vector<2x32xf32>
    %324 = vector.extract_strided_slice %319 {offsets = [0, 96], sizes = [2, 32], strides = [1, 1]} : vector<2x128xf32> to vector<2x32xf32>
    %325 = arith.mulf %322, %274 : vector<2x32xf32>
    %326 = arith.mulf %321, %323 : vector<2x32xf32>
    %327 = arith.addf %325, %326 : vector<2x32xf32>
    %328 = math.tanh %327 : vector<2x32xf32>
    %329 = arith.mulf %324, %328 : vector<2x32xf32>
    %330 = arith.subf %327, %274 : vector<2x32xf32>
    %331 = vector.broadcast %310 : vector<2x1xf32> to vector<2x32xf32>
    %332 = arith.mulf %331, %330 : vector<2x32xf32>
    %333 = arith.addf %274, %332 : vector<2x32xf32>
    %334 = arith.subf %329, %278 : vector<2x32xf32>
    %335 = vector.broadcast %310 : vector<2x1xf32> to vector<2x32xf32>
    %336 = arith.mulf %335, %334 : vector<2x32xf32>
    %337 = arith.addf %278, %336 : vector<2x32xf32>
    %338 = arith.truncf %337 : vector<2x32xf32> to vector<2x32xbf16>
    %cst_52 = arith.constant dense<0.000000e+00> : vector<2x128xf32>
    %339 = tpu.matmul %338, %2, %cst_52 {dimension_numbers = #tpu.dot_dimension_numbers<[1], [0], [0], [1], [0, 0, 1, 1], [], []>} : vector<2x32xbf16>, vector<32x128xbf16>, vector<2x128xf32> -> vector<2x128xf32>
    %340 = vector.broadcast %4 : vector<1x128xf32> to vector<2x128xf32>
    %341 = arith.addf %339, %340 : vector<2x128xf32>
    %342 = arith.truncf %308 : vector<2x32xf32> to vector<2x32xbf16>
    %cst_53 = arith.constant dense<0.000000e+00> : vector<2x128xf32>
    %343 = tpu.matmul %342, %3, %cst_53 {dimension_numbers = #tpu.dot_dimension_numbers<[1], [0], [0], [1], [0, 0, 1, 1], [], []>} : vector<2x32xbf16>, vector<32x128xbf16>, vector<2x128xf32> -> vector<2x128xf32>
    %344 = arith.addf %341, %343 : vector<2x128xf32>
    %345 = arith.negf %344 : vector<2x128xf32>
    %346 = math.exp %345 : vector<2x128xf32>
    %cst_54 = arith.constant 1.000000e+00 : f32
    %347 = vector.broadcast %cst_54 : f32 to vector<2x128xf32>
    %348 = arith.addf %347, %346 : vector<2x128xf32>
    %349 = arith.divf %347, %348 : vector<2x128xf32>
    %350 = math.tanh %344 : vector<2x128xf32>
    %351 = vector.extract_strided_slice %349 {offsets = [0, 0], sizes = [2, 32], strides = [1, 1]} : vector<2x128xf32> to vector<2x32xf32>
    %352 = vector.extract_strided_slice %349 {offsets = [0, 32], sizes = [2, 32], strides = [1, 1]} : vector<2x128xf32> to vector<2x32xf32>
    %353 = vector.extract_strided_slice %350 {offsets = [0, 64], sizes = [2, 32], strides = [1, 1]} : vector<2x128xf32> to vector<2x32xf32>
    %354 = vector.extract_strided_slice %349 {offsets = [0, 96], sizes = [2, 32], strides = [1, 1]} : vector<2x128xf32> to vector<2x32xf32>
    %355 = arith.mulf %352, %304 : vector<2x32xf32>
    %356 = arith.mulf %351, %353 : vector<2x32xf32>
    %357 = arith.addf %355, %356 : vector<2x32xf32>
    %358 = math.tanh %357 : vector<2x32xf32>
    %359 = arith.mulf %354, %358 : vector<2x32xf32>
    %360 = arith.subf %357, %304 : vector<2x32xf32>
    %361 = vector.broadcast %310 : vector<2x1xf32> to vector<2x32xf32>
    %362 = arith.mulf %361, %360 : vector<2x32xf32>
    %363 = arith.addf %304, %362 : vector<2x32xf32>
    %364 = arith.subf %359, %308 : vector<2x32xf32>
    %365 = vector.broadcast %310 : vector<2x1xf32> to vector<2x32xf32>
    %366 = arith.mulf %365, %364 : vector<2x32xf32>
    %367 = arith.addf %308, %366 : vector<2x32xf32>
    %c10 = arith.constant 10 : index
    %c0_55 = arith.constant 0 : index
    %368 = vector.load %arg11[%c10, %c0_55] : memref<16x32xf32, #tpu.memory_space<vmem>>, vector<2x32xf32>
    tpu.vector_store %arg11[%c10, %c0_55], %367 {strides = array<i32>} : memref<16x32xf32, #tpu.memory_space<vmem>>, vector<2x32xf32>,
    %369 = vector.extract_strided_slice %0 {offsets = [12, 0], sizes = [2, 1], strides = [1, 1]} : vector<16x1xf32> to vector<2x1xf32>
    %370 = vector.extract_strided_slice %10 {offsets = [12, 0], sizes = [2, 128], strides = [1, 1]} : vector<16x128xf32> to vector<2x128xf32>
    %371 = arith.truncf %337 : vector<2x32xf32> to vector<2x32xbf16>
    %cst_56 = arith.constant dense<0.000000e+00> : vector<2x128xf32>
    %372 = tpu.matmul %371, %1, %cst_56 {dimension_numbers = #tpu.dot_dimension_numbers<[1], [0], [0], [1], [0, 0, 1, 1], [], []>} : vector<2x32xbf16>, vector<32x128xbf16>, vector<2x128xf32> -> vector<2x128xf32>
    %373 = arith.addf %370, %372 : vector<2x128xf32>
    %374 = arith.negf %373 : vector<2x128xf32>
    %375 = math.exp %374 : vector<2x128xf32>
    %cst_57 = arith.constant 1.000000e+00 : f32
    %376 = vector.broadcast %cst_57 : f32 to vector<2x128xf32>
    %377 = arith.addf %376, %375 : vector<2x128xf32>
    %378 = arith.divf %376, %377 : vector<2x128xf32>
    %379 = math.tanh %373 : vector<2x128xf32>
    %380 = vector.extract_strided_slice %378 {offsets = [0, 0], sizes = [2, 32], strides = [1, 1]} : vector<2x128xf32> to vector<2x32xf32>
    %381 = vector.extract_strided_slice %378 {offsets = [0, 32], sizes = [2, 32], strides = [1, 1]} : vector<2x128xf32> to vector<2x32xf32>
    %382 = vector.extract_strided_slice %379 {offsets = [0, 64], sizes = [2, 32], strides = [1, 1]} : vector<2x128xf32> to vector<2x32xf32>
    %383 = vector.extract_strided_slice %378 {offsets = [0, 96], sizes = [2, 32], strides = [1, 1]} : vector<2x128xf32> to vector<2x32xf32>
    %384 = arith.mulf %381, %333 : vector<2x32xf32>
    %385 = arith.mulf %380, %382 : vector<2x32xf32>
    %386 = arith.addf %384, %385 : vector<2x32xf32>
    %387 = math.tanh %386 : vector<2x32xf32>
    %388 = arith.mulf %383, %387 : vector<2x32xf32>
    %389 = arith.subf %386, %333 : vector<2x32xf32>
    %390 = vector.broadcast %369 : vector<2x1xf32> to vector<2x32xf32>
    %391 = arith.mulf %390, %389 : vector<2x32xf32>
    %392 = arith.addf %333, %391 : vector<2x32xf32>
    %393 = arith.subf %388, %337 : vector<2x32xf32>
    %394 = vector.broadcast %369 : vector<2x1xf32> to vector<2x32xf32>
    %395 = arith.mulf %394, %393 : vector<2x32xf32>
    %396 = arith.addf %337, %395 : vector<2x32xf32>
    %397 = arith.truncf %396 : vector<2x32xf32> to vector<2x32xbf16>
    %cst_58 = arith.constant dense<0.000000e+00> : vector<2x128xf32>
    %398 = tpu.matmul %397, %2, %cst_58 {dimension_numbers = #tpu.dot_dimension_numbers<[1], [0], [0], [1], [0, 0, 1, 1], [], []>} : vector<2x32xbf16>, vector<32x128xbf16>, vector<2x128xf32> -> vector<2x128xf32>
    %399 = vector.broadcast %4 : vector<1x128xf32> to vector<2x128xf32>
    %400 = arith.addf %398, %399 : vector<2x128xf32>
    %401 = arith.truncf %367 : vector<2x32xf32> to vector<2x32xbf16>
    %cst_59 = arith.constant dense<0.000000e+00> : vector<2x128xf32>
    %402 = tpu.matmul %401, %3, %cst_59 {dimension_numbers = #tpu.dot_dimension_numbers<[1], [0], [0], [1], [0, 0, 1, 1], [], []>} : vector<2x32xbf16>, vector<32x128xbf16>, vector<2x128xf32> -> vector<2x128xf32>
    %403 = arith.addf %400, %402 : vector<2x128xf32>
    %404 = arith.negf %403 : vector<2x128xf32>
    %405 = math.exp %404 : vector<2x128xf32>
    %cst_60 = arith.constant 1.000000e+00 : f32
    %406 = vector.broadcast %cst_60 : f32 to vector<2x128xf32>
    %407 = arith.addf %406, %405 : vector<2x128xf32>
    %408 = arith.divf %406, %407 : vector<2x128xf32>
    %409 = math.tanh %403 : vector<2x128xf32>
    %410 = vector.extract_strided_slice %408 {offsets = [0, 0], sizes = [2, 32], strides = [1, 1]} : vector<2x128xf32> to vector<2x32xf32>
    %411 = vector.extract_strided_slice %408 {offsets = [0, 32], sizes = [2, 32], strides = [1, 1]} : vector<2x128xf32> to vector<2x32xf32>
    %412 = vector.extract_strided_slice %409 {offsets = [0, 64], sizes = [2, 32], strides = [1, 1]} : vector<2x128xf32> to vector<2x32xf32>
    %413 = vector.extract_strided_slice %408 {offsets = [0, 96], sizes = [2, 32], strides = [1, 1]} : vector<2x128xf32> to vector<2x32xf32>
    %414 = arith.mulf %411, %363 : vector<2x32xf32>
    %415 = arith.mulf %410, %412 : vector<2x32xf32>
    %416 = arith.addf %414, %415 : vector<2x32xf32>
    %417 = math.tanh %416 : vector<2x32xf32>
    %418 = arith.mulf %413, %417 : vector<2x32xf32>
    %419 = arith.subf %416, %363 : vector<2x32xf32>
    %420 = vector.broadcast %369 : vector<2x1xf32> to vector<2x32xf32>
    %421 = arith.mulf %420, %419 : vector<2x32xf32>
    %422 = arith.addf %363, %421 : vector<2x32xf32>
    %423 = arith.subf %418, %367 : vector<2x32xf32>
    %424 = vector.broadcast %369 : vector<2x1xf32> to vector<2x32xf32>
    %425 = arith.mulf %424, %423 : vector<2x32xf32>
    %426 = arith.addf %367, %425 : vector<2x32xf32>
    %c12 = arith.constant 12 : index
    %c0_61 = arith.constant 0 : index
    %427 = vector.load %arg11[%c12, %c0_61] : memref<16x32xf32, #tpu.memory_space<vmem>>, vector<2x32xf32>
    tpu.vector_store %arg11[%c12, %c0_61], %426 {strides = array<i32>} : memref<16x32xf32, #tpu.memory_space<vmem>>, vector<2x32xf32>,
    %428 = vector.extract_strided_slice %0 {offsets = [14, 0], sizes = [2, 1], strides = [1, 1]} : vector<16x1xf32> to vector<2x1xf32>
    %429 = vector.extract_strided_slice %10 {offsets = [14, 0], sizes = [2, 128], strides = [1, 1]} : vector<16x128xf32> to vector<2x128xf32>
    %430 = arith.truncf %396 : vector<2x32xf32> to vector<2x32xbf16>
    %cst_62 = arith.constant dense<0.000000e+00> : vector<2x128xf32>
    %431 = tpu.matmul %430, %1, %cst_62 {dimension_numbers = #tpu.dot_dimension_numbers<[1], [0], [0], [1], [0, 0, 1, 1], [], []>} : vector<2x32xbf16>, vector<32x128xbf16>, vector<2x128xf32> -> vector<2x128xf32>
    %432 = arith.addf %429, %431 : vector<2x128xf32>
    %433 = arith.negf %432 : vector<2x128xf32>
    %434 = math.exp %433 : vector<2x128xf32>
    %cst_63 = arith.constant 1.000000e+00 : f32
    %435 = vector.broadcast %cst_63 : f32 to vector<2x128xf32>
    %436 = arith.addf %435, %434 : vector<2x128xf32>
    %437 = arith.divf %435, %436 : vector<2x128xf32>
    %438 = math.tanh %432 : vector<2x128xf32>
    %439 = vector.extract_strided_slice %437 {offsets = [0, 0], sizes = [2, 32], strides = [1, 1]} : vector<2x128xf32> to vector<2x32xf32>
    %440 = vector.extract_strided_slice %437 {offsets = [0, 32], sizes = [2, 32], strides = [1, 1]} : vector<2x128xf32> to vector<2x32xf32>
    %441 = vector.extract_strided_slice %438 {offsets = [0, 64], sizes = [2, 32], strides = [1, 1]} : vector<2x128xf32> to vector<2x32xf32>
    %442 = vector.extract_strided_slice %437 {offsets = [0, 96], sizes = [2, 32], strides = [1, 1]} : vector<2x128xf32> to vector<2x32xf32>
    %443 = arith.mulf %440, %392 : vector<2x32xf32>
    %444 = arith.mulf %439, %441 : vector<2x32xf32>
    %445 = arith.addf %443, %444 : vector<2x32xf32>
    %446 = math.tanh %445 : vector<2x32xf32>
    %447 = arith.mulf %442, %446 : vector<2x32xf32>
    %448 = arith.subf %447, %396 : vector<2x32xf32>
    %449 = vector.broadcast %428 : vector<2x1xf32> to vector<2x32xf32>
    %450 = arith.mulf %449, %448 : vector<2x32xf32>
    %451 = arith.addf %396, %450 : vector<2x32xf32>
    %452 = arith.truncf %451 : vector<2x32xf32> to vector<2x32xbf16>
    %cst_64 = arith.constant dense<0.000000e+00> : vector<2x128xf32>
    %453 = tpu.matmul %452, %2, %cst_64 {dimension_numbers = #tpu.dot_dimension_numbers<[1], [0], [0], [1], [0, 0, 1, 1], [], []>} : vector<2x32xbf16>, vector<32x128xbf16>, vector<2x128xf32> -> vector<2x128xf32>
    %454 = vector.broadcast %4 : vector<1x128xf32> to vector<2x128xf32>
    %455 = arith.addf %453, %454 : vector<2x128xf32>
    %456 = arith.truncf %426 : vector<2x32xf32> to vector<2x32xbf16>
    %cst_65 = arith.constant dense<0.000000e+00> : vector<2x128xf32>
    %457 = tpu.matmul %456, %3, %cst_65 {dimension_numbers = #tpu.dot_dimension_numbers<[1], [0], [0], [1], [0, 0, 1, 1], [], []>} : vector<2x32xbf16>, vector<32x128xbf16>, vector<2x128xf32> -> vector<2x128xf32>
    %458 = arith.addf %455, %457 : vector<2x128xf32>
    %459 = arith.negf %458 : vector<2x128xf32>
    %460 = math.exp %459 : vector<2x128xf32>
    %cst_66 = arith.constant 1.000000e+00 : f32
    %461 = vector.broadcast %cst_66 : f32 to vector<2x128xf32>
    %462 = arith.addf %461, %460 : vector<2x128xf32>
    %463 = arith.divf %461, %462 : vector<2x128xf32>
    %464 = math.tanh %458 : vector<2x128xf32>
    %465 = vector.extract_strided_slice %463 {offsets = [0, 0], sizes = [2, 32], strides = [1, 1]} : vector<2x128xf32> to vector<2x32xf32>
    %466 = vector.extract_strided_slice %463 {offsets = [0, 32], sizes = [2, 32], strides = [1, 1]} : vector<2x128xf32> to vector<2x32xf32>
    %467 = vector.extract_strided_slice %464 {offsets = [0, 64], sizes = [2, 32], strides = [1, 1]} : vector<2x128xf32> to vector<2x32xf32>
    %468 = vector.extract_strided_slice %463 {offsets = [0, 96], sizes = [2, 32], strides = [1, 1]} : vector<2x128xf32> to vector<2x32xf32>
    %469 = arith.mulf %466, %422 : vector<2x32xf32>
    %470 = arith.mulf %465, %467 : vector<2x32xf32>
    %471 = arith.addf %469, %470 : vector<2x32xf32>
    %472 = math.tanh %471 : vector<2x32xf32>
    %473 = arith.mulf %468, %472 : vector<2x32xf32>
    %474 = arith.subf %473, %426 : vector<2x32xf32>
    %475 = vector.broadcast %428 : vector<2x1xf32> to vector<2x32xf32>
    %476 = arith.mulf %475, %474 : vector<2x32xf32>
    %477 = arith.addf %426, %476 : vector<2x32xf32>
    %c14 = arith.constant 14 : index
    %c0_67 = arith.constant 0 : index
    %478 = vector.load %arg11[%c14, %c0_67] : memref<16x32xf32, #tpu.memory_space<vmem>>, vector<2x32xf32>
    tpu.vector_store %arg11[%c14, %c0_67], %477 {strides = array<i32>} : memref<16x32xf32, #tpu.memory_space<vmem>>, vector<2x32xf32>,
    %c0_68 = arith.constant 0 : index
    %c0_69 = arith.constant 0 : index
    %479 = vector.load %arg11[%c0_68, %c0_69] : memref<16x32xf32, #tpu.memory_space<vmem>>, vector<16x32xf32>
    %480 = vector.broadcast %0 : vector<16x1xf32> to vector<16x32xf32>
    %481 = arith.mulf %479, %480 : vector<16x32xf32>
    %482 = arith.truncf %481 : vector<16x32xf32> to vector<16x32xbf16>
    %c0_70 = arith.constant 0 : index
    %c0_71 = arith.constant 0 : index
    %483 = vector.load %arg8[%c0_70, %c0_71] : memref<32x16xbf16, #tpu.memory_space<vmem>>, vector<32x16xbf16>
    %cst_72 = arith.constant dense<0.000000e+00> : vector<16x16xf32>
    %484 = tpu.matmul %482, %483, %cst_72 {dimension_numbers = #tpu.dot_dimension_numbers<[1], [0], [0], [1], [0, 0, 1, 1], [], []>} : vector<16x32xbf16>, vector<32x16xbf16>, vector<16x16xf32> -> vector<16x16xf32>
    %c0_73 = arith.constant 0 : index
    %c0_74 = arith.constant 0 : index
    %485 = vector.load %arg9[%c0_73, %c0_74] : memref<1x16xf32, #tpu.memory_space<vmem>>, vector<1x16xf32>
    %486 = vector.broadcast %485 : vector<1x16xf32> to vector<16x16xf32>
    %487 = arith.addf %484, %486 : vector<16x16xf32>
    %c0_75 = arith.constant 0 : index
    %c0_76 = arith.constant 0 : index
    %488 = vector.load %arg10[%c0_75, %c0_76] : memref<16x16xf32, #tpu.memory_space<vmem>>, vector<16x16xf32>
    tpu.vector_store %arg10[%c0_75, %c0_76], %487 {strides = array<i32>} : memref<16x16xf32, #tpu.memory_space<vmem>>, vector<16x16xf32>,
    return
  }
}

</mosaic_0001>

<bundles_post_ra>
// kernel: tpu_custom_call.1
= control target key start
LH: loop header
LB: loop body
LE: loop exit
PB: predicated region body
PF: predicated region fallthrough
CT: control target
= control target key end

     0   :  { %vm71_vm0 = vcmask 1043456   ;;  %v2606_v1 = vmov 0.0   ;;  %vm2607_vm1 = vmmov 0   ;;  %vm67_vm2 = vcmask 64512   ;;  %s3289_s0 = inlined_call_operand.vmem [shape: f32[16,1], index: 0, kind: input, shape index: {}]   ;;  %s3290_s1 = inlined_call_operand.vmem [shape: bf16[16,8], index: 1, kind: input, shape index: {}]   ;;  %s3291_s2 = inlined_call_operand.vmem [shape: bf16[8,128], index: 2, kind: input, shape index: {}]   ;;  %s3292_s3 = inlined_call_operand.vmem [shape: bf16[32,128], index: 3, kind: input, shape index: {}]   ;;  %s3293_s4 = inlined_call_operand.vmem [shape: f32[1,128], index: 4, kind: input, shape index: {}]   ;;  %s3294_s5 = inlined_call_operand.vmem [shape: bf16[32,128], index: 5, kind: input, shape index: {}]   ;;  %s3295_s6 = inlined_call_operand.vmem [shape: bf16[32,128], index: 6, kind: input, shape index: {}]   ;;  %s3296_s7 = inlined_call_operand.vmem [shape: f32[1,128], index: 7, kind: input, shape index: {}]   ;;  %s3297_s8 = inlined_call_operand.vmem [shape: bf16[32,16], index: 8, kind: input, shape index: {}]   ;;  %s3298_s9 = inlined_call_operand.vmem [shape: f32[1,16], index: 9, kind: input, shape index: {}]   ;;  %s3299_s10 = inlined_call_operand.hbm [shape: f32[16,16], index: 10, kind: output, shape index: {}]  }
   0x1   :  { %v54_v0 = vld [vmem:[%s3291_s2] sm:$0xf]  ;;  %2181 = vmatprep.subr.bf16.mxu0 %v2606_v1  ;;  %2187 = vmatprep.subr.bf16.mxu1 %v2606_v1  ;;  %v2689_v5 = vld [vmem:[%s3292_s3 + $0x8] sm:$0xff]   ;;  %v2608_v6 = vmov 0  }
   0x2   :  { %v73_v2 = vsel %vm71_vm0, %v54_v0, 0  ;;  %v2678_v3 = vld [vmem:[%s3292_s3] sm:$0xff]   ;;  %2183 = vmatprep.mubr.msk.bf16.mxu0 %vm2607_vm1, %v2606_v1  ;;  %2191 = vmatprep.mubr.msk.bf16.mxu1 %vm2607_vm1, %v2606_v1 }
   0x3   :  { %v2439_v4 = vld [vmem:[%s3290_s1] sm:$0xff]   ;;  %2182 = vmatpush3.bf16.msra.mxu0 %v73_v2  ;;  %2188 = vmatpush3.bf16.msra.mxu1 %v2678_v3 }
   0x4   :  { %2189 = vmatprep.subr.bf16.mxu1 %v2606_v1  ;;  %2436 = vset.pattern.permute.xlu1 %v2608_v6 }
   0x5   :  { %2195 = vmatprep.subr.bf16.mxu0 %v2606_v1  ;;  %2437 = vset.pattern.permute.xlu0 %v2608_v6 }
   0x6   :  { %2184 = vmatmul.mubr.msk.bf16.vlgmr.msra.gmra.mrb[0].mxu0 %vm67_vm2, %v2439_v4 }
   0x7   :  { %2199 = vmatprep.mubr.msk.bf16.mxu0 %vm2607_vm1, %v2606_v1  ;;  %2190 = vmatpush3.bf16.msra.mxu1 %v2689_v5 }
   0x8   :  { %2211 = vmatprep.subr.bf16.mxu1 %v2606_v1 }
   0x9   :  { %15 = vsyncpa [#allocation4], 0  ;;  %v37_v7 = vld [vmem:[%s3289_s0] sm:$0xff]  ;;  %s2609_s23 = smov 64   ;;  %v2733_v31 = vld [vmem:[%s3294_s5 + $0x8] sm:$0xff]   ;;  %vm128_vm3 = vcmask 261120  }
   0xa   :  { %2192 = vmatmul.mubr.bf16.vlgmr.msra.gmra.mrb[0].mxu1 %v2608_v6  ;;  %199 = vperm.xlu1 %2436, %v37_v7   ;;  %v2052_v8 = vld [vmem:[%s3293_s4] ss:$0 sm:$0xff]  ;;  %s2610_s4 = smov 32   ;;  %v2758_v40 = vld [vmem:[%s3295_s6 + $0x8] sm:$0xff]   ;;  %s2611_s14 = smov 96   ;;  %vm356_vm4 = vcmask 254976  }
   0xb   :  { %2212 = vmatpush3.bf16.msra.mxu1 %v2678_v3  ;;  %2215 = vmatprep.mubr.msk.bf16.mxu1 %vm2607_vm1, %v2606_v1  ;;  %v2727_v30 = vld [vmem:[%s3294_s5] sm:$0xff]   ;;  %s2612_s28 = smov [#allocation3]   ;;  %vm2033_vm5 = vcmask 130048  }
   0xc   :  { %2213 = vmatprep.subr.bf16.mxu1 %v2606_v1  ;;  %2196 = vmatpush3.bf16.msra.mxu0 %v2727_v30  ;;  %v2750_v38 = vld [vmem:[%s3295_s6] sm:$0xff]   ;;  %s2041_s29 = sshll.u32 %s2612_s28, 4  ;;  %s2042_s29 = int_to_ptr.vmem [resolvable:$true] %s2041_s29 }
   0xd   :  { %2197 = vmatprep.subr.bf16.mxu0 %v2606_v1  ;;  %v2782_v47 = vld [vmem:[%s3296_s7] ss:$0 sm:$0xff]  ;;  %s2582_s30 = scalar_lea.vmem %s2042_s29, 256  ;;  %p2587_p1 = scmp.lt.s32.totalorder %s2042_s29, %s2042_s29 }
   0xe   :  { %p2583_p0 = scmp.ne.s32.totalorder %s2042_s29, %s2582_s30  ;;  %p2588_p2 = scmp.lt.s32.totalorder %s2582_s30, %s2582_s30 }
   0xf   :  { %2214 = vmatpush3.bf16.msra.mxu1 %v2689_v5 }
  0x10   :  { %2219 = vmatprep.subr.bf16.mxu1 %v2606_v1  ;;  %2198 = vmatpush3.bf16.msra.mxu0 %v2733_v31  ;;  %p2589_p3 = por %p2588_p2, %p2587_p1 }
  0x11   :  { %2203 = vmatprep.subr.bf16.mxu0 %v2606_v1 }
  0x12   :  { %p2590_p4 = pnand %p2589_p3, %p2583_p0 }
  0x89   :  { %v2739_v33 = vpop.permute.xlu1 %199 }
  0xd9   :  { %v109_v9 = vpop.f32.mrb[0].mxu0 }
  0xda   :  { %v2185_v10 = vpop.f32.mrb[1].mxu0  ;;  %v2714_v11 = vadd.f32 %v2052_v8, %v109_v9 }
  0xdb   :  { %v112_v12 = vpop.f32.mrb[2].mxu0 }
  0xdc   :  { %v2716_v13 = vadd.f32 %v2052_v8, %v112_v12  ;;  %v2186_v14 = vpop.f32.mrb[3].mxu0 }
  0xdd   :  { %v166_v15 = vpop.f32.mrb[0].mxu1 }
  0xde   :  { %v172_v16 = vadd.f32 %v166_v15, %v2714_v11  ;;  %v2193_v17 = vpop.f32.mrb[1].mxu1 }
  0xdf   :  { %v169_v18 = vpop.f32.mrb[2].mxu1 }
  0xe0   :  { %2447 = vtanh.f32 %v172_v16  ;;  %v2194_v19 = vpop.f32.mrb[3].mxu1  ;;  %v2057_v21 = vmul.f32 -1.442695, %v172_v16 }
  0xe2   :  { %2449 = vpow2.f32 %v2057_v21 }
  0xea   :  { %v2448_v20 = vpop.eup %2447 }
  0xeb   :  { %182 = vrot.lane.b32.xlu0 %v2448_v20, %s2609_s23 }
  0xec   :  { %v2450_v22 = vpop.eup %2449 }
  0xed   :  { %v176_v23 = vadd.f32 1.0, %v2450_v22 }
  0xef   :  { %2451 = vrcp.f32 %v176_v23 }
  0xf9   :  { %v2452_v24 = vpop.eup %2451 }
  0xfa   :  { %v180_v27 = vmul.f32 0.0, %v2452_v24 }
 0x15d   :  { %v183_v25 = vpop.permute.xlu0 %182 }
 0x15e   :  { %v185_v26 = vmul.f32 %v2452_v24, %v183_v25 }
 0x160   :  { %187 = vrot.lane.b32.xlu0 %v185_v26, %s2610_s4 }
 0x1d2   :  { %v188_v28 = vpop.permute.xlu0 %187 }
 0x1d3   :  { %v2721_v29 = vadd.f32 %v188_v28, %v180_v27 }
 0x1d5   :  { %2453 = vtanh.f32 %v2721_v29 }
 0x1df   :  { %v2454_v32 = vpop.eup %2453 }
 0x1e0   :  { %193 = vrot.lane.b32.xlu1 %v2454_v32, %s2609_s23 }
 0x252   :  { %v194_v34 = vpop.permute.xlu1 %193 }
 0x253   :  { %v196_v35 = vmul.f32 %v2452_v24, %v194_v34 }
 0x255   :  { %v2742_v36 = vmul.f32 %v2739_v33, %v196_v35 }
 0x257   :  { %v206_v37 = vpack.c.bf16 %v2742_v36, %v2742_v36  ;;  %v436_v19 = vrot.slane %v2742_v36, 6 }
 0x259   :  { %214 = vrot.lane.b32.xlu0 %v206_v37, %s2610_s4 }
 0x2cb   :  { %v215_v39 = vpop.permute.xlu0 %214 }
 0x2cc   :  { %2200 = vmatmul.mubr.msk.bf16.vlgmr.msra.gmra.mrb[4].mxu0 %vm128_vm3, %v215_v39  ;;  %2216 = vmatmul.mubr.msk.bf16.vlgmr.msra.gmra.mrb[4].mxu1 %vm128_vm3, %v215_v39 }
 0x2cd   :  { %2204 = vmatpush3.bf16.msra.mxu0 %v2750_v38  ;;  %2207 = vmatprep.mubr.msk.bf16.mxu0 %vm2607_vm1, %v2606_v1 }
 0x2ce   :  { %2205 = vmatprep.subr.bf16.mxu0 %v2606_v1  ;;  %2220 = vmatpush3.bf16.msra.mxu1 %v2727_v30 }
 0x2cf   :  { %2221 = vmatprep.subr.bf16.mxu1 %v2606_v1  ;;  %2223 = vmatprep.mubr.msk.bf16.mxu1 %vm2607_vm1, %v2606_v1 }
 0x2d1   :  { %2206 = vmatpush3.bf16.msra.mxu0 %v2758_v40 }
 0x2d2   :  { %2235 = vmatprep.subr.bf16.mxu0 %v2606_v1  ;;  %2222 = vmatpush3.bf16.msra.mxu1 %v2733_v31 }
 0x2d3   :  { %2227 = vmatprep.subr.bf16.mxu1 %v2606_v1 }
 0x2d8   :  { %2208 = vmatmul.mubr.bf16.vlgmr.msra.gmra.mrb[4].mxu0 %v2608_v6  ;;  %v2791_v6 = vmul.f32 %v2739_v33, %v2721_v29 }
 0x2d9   :  { %2236 = vmatpush3.bf16.msra.mxu0 %v2678_v3  ;;  %2239 = vmatprep.mubr.msk.bf16.mxu0 %vm2607_vm1, %v2606_v1 }
 0x2da   :  { %2237 = vmatprep.subr.bf16.mxu0 %v2606_v1  ;;  %v410_v7 = vrot.slane %v2791_v6, 6 }
 0x2dd   :  { %2238 = vmatpush3.bf16.msra.mxu0 %v2689_v5 }
 0x2de   :  { %2243 = vmatprep.subr.bf16.mxu0 %v2606_v1 }
 0x39f   :  { %v392_v41 = vpop.f32.mrb[4].mxu1 }
 0x3a0   :  { %v399_v42 = vrot.slane %v392_v41, 6  ;;  %v2217_v43 = vpop.f32.mrb[5].mxu1 }
 0x3a1   :  { %v395_v44 = vpop.f32.mrb[6].mxu1 }
 0x3a2   :  { %v401_v45 = vadd.f32 %v399_v42, %v2714_v11  ;;  %v2218_v46 = vpop.f32.mrb[7].mxu1 }
 0x3a4   :  { %2455 = vtanh.f32 %v401_v45  ;;  %v2066_v55 = vmul.f32 -1.442695, %v401_v45 }
 0x3ab   :  { %v317_v48 = vpop.f32.mrb[4].mxu0 }
 0x3ac   :  { %v2387_v49 = vadd.f32 %v2782_v47, %v317_v48  ;;  %v2209_v50 = vpop.f32.mrb[5].mxu0 }
 0x3ad   :  { %v320_v51 = vpop.f32.mrb[6].mxu0 }
 0x3ae   :  { %v2456_v52 = vpop.eup %2455  ;;  %2457 = vtanh.f32 %v2387_v49  ;;  %v2210_v53 = vpop.f32.mrb[7].mxu0  ;;  %v2064_v56 = vmul.f32 -1.442695, %v2387_v49 }
 0x3af   :  { %414 = vrot.lane.b32.xlu1 %v2456_v52, %s2609_s23  ;;  %2459 = vpow2.f32 %v2066_v55 }
 0x3b0   :  { %2461 = vpow2.f32 %v2064_v56 }
 0x3b8   :  { %v2458_v54 = vpop.eup %2457 }
 0x3b9   :  { %333 = vrot.lane.b32.xlu0 %v2458_v54, %s2609_s23  ;;  %v2460_v57 = vpop.eup %2459 }
 0x3ba   :  { %v405_v58 = vadd.f32 1.0, %v2460_v57  ;;  %v2462_v59 = vpop.eup %2461 }
 0x3bb   :  { %v327_v60 = vadd.f32 1.0, %v2462_v59 }
 0x3bc   :  { %2463 = vrcp.f32 %v405_v58 }
 0x3bd   :  { %2465 = vrcp.f32 %v327_v60 }
 0x3c6   :  { %v2464_v61 = vpop.eup %2463 }
 0x3c7   :  { %v2466_v0 = vpop.eup %2465  ;;  %v412_v8 = vmul.f32 %v2464_v61, %v410_v7 }
 0x3c8   :  { %v331_v12 = vmul.f32 0.0, %v2466_v0 }
 0x421   :  { %v415_v62 = vpop.permute.xlu1 %414 }
 0x422   :  { %v417_v63 = vmul.f32 %v2464_v61, %v415_v62 }
 0x424   :  { %419 = vrot.lane.b32.xlu1 %v417_v63, %s2610_s4 }
 0x42b   :  { %v334_v2 = vpop.permute.xlu0 %333 }
 0x42c   :  { %v336_v4 = vmul.f32 %v2466_v0, %v334_v2 }
 0x42e   :  { %338 = vrot.lane.b32.xlu0 %v336_v4, %s2610_s4 }
 0x496   :  { %v420_v9 = vpop.permute.xlu1 %419 }
 0x497   :  { %v2796_v10 = vadd.f32 %v420_v9, %v412_v8 }
 0x499   :  { %2467 = vtanh.f32 %v2796_v10  ;;  %v429_v63 = vsub.f32 %v2796_v10, %v410_v7 }
 0x4a0   :  { %v339_v14 = vpop.permute.xlu0 %338 }
 0x4a1   :  { %v2799_v15 = vadd.f32 %v339_v14, %v331_v12 }
 0x4a3   :  { %v2468_v16 = vpop.eup %2467  ;;  %2469 = vtanh.f32 %v2799_v15  ;;  %v2851_v4 = vmul.f32 %v2799_v15, %v2739_v33 }
 0x4a4   :  { %425 = vrot.lane.b32.xlu1 %v2468_v16, %s2609_s23 }
 0x4ad   :  { %v2470_v17 = vpop.eup %2469 }
 0x4ae   :  { %344 = vrot.lane.b32.xlu0 %v2470_v17, %s2609_s23 }
 0x516   :  { %v426_v18 = vpop.permute.xlu1 %425 }
 0x517   :  { %v428_v20 = vmul.f32 %v2464_v61, %v426_v18 }
 0x519   :  { %v438_v21 = vsub.f32 %v428_v20, %v436_v19 }
 0x51b   :  { %v439_v22 = vmul.f32 %v438_v21, %v2739_v33 }
 0x51d   :  { %v441_v23 = vrot.slane %v439_v22, 2 }
 0x51f   :  { %v2807_v24 = vadd.f32 %v441_v23, %v2742_v36 }
 0x520   :  { %v345_v25 = vpop.permute.xlu0 %344 }
 0x521   :  { %v347_v26 = vmul.f32 %v2466_v0, %v345_v25  ;;  %v444_v27 = vpack.c.bf16 %v2807_v24, %v2807_v24  ;;  %v430_v0 = vmul.f32 %v429_v63, %v2739_v33  ;;  %v672_v23 = vrot.slane %v2807_v24, 4 }
 0x523   :  { %v2812_v28 = vmul.f32 %v347_v26, %v2739_v33  ;;  %446 = vrot.lane.b32.xlu1 %v444_v27, %s2610_s4  ;;  %v432_v2 = vrot.slane %v430_v0, 2 }
 0x525   :  { %v491_v29 = vpack.c.bf16 %v2812_v28, %v2812_v28  ;;  %v2854_v8 = vadd.f32 %v432_v2, %v2791_v6 }
 0x527   :  { %493 = vrot.lane.b32.xlu0 %v491_v29, %s2610_s4  ;;  %v646_v16 = vrot.slane %v2854_v8, 4 }
 0x595   :  { %v447_v32 = vpop.permute.xlu1 %446 }
 0x596   :  { %2224 = vmatmul.mubr.msk.bf16.vlgmr.msra.gmra.mrb[8].mxu1 %vm128_vm3, %v447_v32  ;;  %2240 = vmatmul.mubr.msk.bf16.vlgmr.msra.gmra.mrb[8].mxu0 %vm128_vm3, %v447_v32 }
 0x597   :  { %2228 = vmatpush3.bf16.msra.mxu1 %v2750_v38  ;;  %2231 = vmatprep.mubr.msk.bf16.mxu1 %vm2607_vm1, %v2606_v1 }
 0x598   :  { %2229 = vmatprep.subr.bf16.mxu1 %v2606_v1  ;;  %2244 = vmatpush3.bf16.msra.mxu0 %v2727_v30 }
 0x599   :  { %2245 = vmatprep.subr.bf16.mxu0 %v2606_v1  ;;  %2247 = vmatprep.mubr.msk.bf16.mxu0 %vm2607_vm1, %v2606_v1  ;;  %v494_v34 = vpop.permute.xlu0 %493 }
 0x59b   :  { %2230 = vmatpush3.bf16.msra.mxu1 %v2758_v40 }
 0x59c   :  { %2259 = vmatprep.subr.bf16.mxu1 %v2606_v1  ;;  %2246 = vmatpush3.bf16.msra.mxu0 %v2733_v31 }
 0x59d   :  { %2251 = vmatprep.subr.bf16.mxu0 %v2606_v1 }
 0x5a2   :  { %2232 = vmatmul.mubr.msk.bf16.vlgmr.msra.gmra.mrb[8].mxu1 %vm128_vm3, %v494_v34 }
 0x5a3   :  { %2260 = vmatpush3.bf16.msra.mxu1 %v2678_v3  ;;  %2263 = vmatprep.mubr.msk.bf16.mxu1 %vm2607_vm1, %v2606_v1 }
 0x5a4   :  { %2261 = vmatprep.subr.bf16.mxu1 %v2606_v1 }
 0x5a7   :  { %2262 = vmatpush3.bf16.msra.mxu1 %v2689_v5 }
 0x5a8   :  { %2267 = vmatprep.subr.bf16.mxu1 %v2606_v1 }
 0x669   :  { %v628_v35 = vpop.f32.mrb[8].mxu0 }
 0x66a   :  { %v2241_v36 = vpop.f32.mrb[9].mxu0  ;;  %v635_v41 = vrot.slane %v628_v35, 4 }
 0x66b   :  { %v631_v37 = vpop.f32.mrb[10].mxu0 }
 0x66c   :  { %v2242_v39 = vpop.f32.mrb[11].mxu0  ;;  %v637_v46 = vadd.f32 %v635_v41, %v2714_v11 }
 0x66e   :  { %v2071_v52 = vmul.f32 -1.442695, %v637_v46 }
 0x675   :  { %v532_v42 = vpop.f32.mrb[8].mxu1 }
 0x676   :  { %v2388_v43 = vadd.f32 %v2782_v47, %v532_v42  ;;  %v2233_v44 = vpop.f32.mrb[9].mxu1 }
 0x677   :  { %v535_v45 = vpop.f32.mrb[10].mxu1 }
 0x678   :  { %2471 = vtanh.f32 %v2388_v43  ;;  %v2234_v48 = vpop.f32.mrb[11].mxu1  ;;  %v2069_v51 = vmul.f32 -1.442695, %v2388_v43 }
 0x679   :  { %2473 = vtanh.f32 %v637_v46 }
 0x67a   :  { %2475 = vpow2.f32 %v2069_v51 }
 0x67b   :  { %2477 = vpow2.f32 %v2071_v52 }
 0x682   :  { %v2472_v49 = vpop.eup %2471 }
 0x683   :  { %548 = vrot.lane.b32.xlu1 %v2472_v49, %s2609_s23  ;;  %v2474_v50 = vpop.eup %2473 }
 0x684   :  { %v2476_v53 = vpop.eup %2475 }
 0x685   :  { %v542_v54 = vadd.f32 1.0, %v2476_v53  ;;  %v2478_v55 = vpop.eup %2477 }
 0x686   :  { %v641_v56 = vadd.f32 1.0, %v2478_v55 }
 0x687   :  { %650 = vrot.lane.b32.xlu1 %v2474_v50, %s2609_s23  ;;  %2479 = vrcp.f32 %v542_v54 }
 0x688   :  { %2481 = vrcp.f32 %v641_v56 }
 0x691   :  { %v2480_v57 = vpop.eup %2479 }
 0x692   :  { %v2482_v60 = vpop.eup %2481  ;;  %v546_v9 = vmul.f32 %v2480_v57, %v2851_v4 }
 0x693   :  { %v648_v7 = vmul.f32 %v2482_v60, %v646_v16 }
 0x6f5   :  { %v549_v58 = vpop.permute.xlu1 %548 }
 0x6f6   :  { %v551_v59 = vmul.f32 %v2480_v57, %v549_v58 }
 0x6f8   :  { %553 = vrot.lane.b32.xlu0 %v551_v59, %s2610_s4 }
 0x6f9   :  { %v651_v61 = vpop.permute.xlu1 %650 }
 0x6fa   :  { %v653_v62 = vmul.f32 %v2482_v60, %v651_v61 }
 0x6fc   :  { %655 = vrot.lane.b32.xlu1 %v653_v62, %s2610_s4 }
 0x76a   :  { %v554_v12 = vpop.permute.xlu0 %553 }
 0x76b   :  { %v556_v14 = vadd.f32 %v554_v12, %v546_v9 }
 0x76d   :  { %2483 = vtanh.f32 %v556_v14  ;;  %v563_v34 = vsub.f32 %v556_v14, %v2851_v4 }
 0x76e   :  { %v656_v10 = vpop.permute.xlu1 %655 }
 0x76f   :  { %v2860_v17 = vadd.f32 %v656_v10, %v648_v7  ;;  %v565_v36 = vrot.slane %v563_v34, 6 }
 0x771   :  { %2485 = vtanh.f32 %v2860_v17  ;;  %v665_v63 = vsub.f32 %v2860_v17, %v646_v16 }
 0x773   :  { %v666_v7 = vmul.f32 %v665_v63, %v2739_v33 }
 0x775   :  { %v668_v10 = vrot.slane %v666_v7, 4 }
 0x777   :  { %v2484_v15 = vpop.eup %2483 }
 0x778   :  { %559 = vrot.lane.b32.xlu0 %v2484_v15, %s2609_s23  ;;  %v2917_v15 = vadd.f32 %v668_v10, %v2854_v8 }
 0x77b   :  { %v2486_v6 = vpop.eup %2485 }
 0x77c   :  { %661 = vrot.lane.b32.xlu1 %v2486_v6, %s2609_s23 }
 0x7ea   :  { %v560_v18 = vpop.permute.xlu0 %559 }
 0x7eb   :  { %v562_v19 = vmul.f32 %v2480_v57, %v560_v18  ;;  %v882_v18 = vrot.slane %v2917_v15, 2 }
 0x7ed   :  { %v576_v20 = vsub.f32 %v562_v19, %v2812_v28 }
 0x7ee   :  { %v662_v21 = vpop.permute.xlu1 %661 }
 0x7ef   :  { %v578_v22 = vrot.slane %v576_v20, 6  ;;  %v664_v25 = vmul.f32 %v2482_v60, %v662_v21 }
 0x7f1   :  { %v674_v26 = vsub.f32 %v664_v25, %v672_v23  ;;  %579 = vrot.lane.b32.xlu0 %v578_v22, %s2610_s4 }
 0x7f3   :  { %v675_v27 = vmul.f32 %v674_v26, %v2739_v33 }
 0x7f5   :  { %v677_v29 = vrot.slane %v675_v27, 4 }
 0x7f7   :  { %v2870_v32 = vadd.f32 %v677_v29, %v2807_v24 }
 0x7f9   :  { %v680_v35 = vpack.c.bf16 %v2870_v32, %v2870_v32  ;;  %v908_v29 = vrot.slane %v2870_v32, 2 }
 0x7fb   :  { %682 = vrot.lane.b32.xlu1 %v680_v35, %s2610_s4 }
 0x7ff   :  { %566 = vrot.lane.b32.xlu1 %v565_v36, %s2611_s14 }
 0x863   :  { %v580_v37 = vpop.permute.xlu0 %579 }
 0x864   :  { %v582_v39 = vmul.f32 %v580_v37, %v2739_v33 }
 0x866   :  { %v584_v41 = vrot.slane %v582_v39, 2 }
 0x868   :  { %585 = vrot.lane.b32.xlu0 %v584_v41, %s2611_s14 }
 0x86d   :  { %v683_v42 = vpop.permute.xlu1 %682 }
 0x86e   :  { %2248 = vmatmul.mubr.msk.bf16.vlgmr.msra.gmra.mrb[12].mxu0 %vm128_vm3, %v683_v42  ;;  %2264 = vmatmul.mubr.msk.bf16.vlgmr.msra.gmra.mrb[12].mxu1 %vm128_vm3, %v683_v42 }
 0x86f   :  { %2252 = vmatpush3.bf16.msra.mxu0 %v2750_v38  ;;  %2255 = vmatprep.mubr.msk.bf16.mxu0 %vm2607_vm1, %v2606_v1 }
 0x870   :  { %2253 = vmatprep.subr.bf16.mxu0 %v2606_v1  ;;  %2268 = vmatpush3.bf16.msra.mxu1 %v2727_v30 }
 0x871   :  { %v567_v24 = vpop.permute.xlu1 %566  ;;  %2269 = vmatprep.subr.bf16.mxu1 %v2606_v1  ;;  %2271 = vmatprep.mubr.msk.bf16.mxu1 %vm2607_vm1, %v2606_v1 }
 0x872   :  { %v569_v43 = vmul.f32 %v567_v24, %v2739_v33 }
 0x873   :  { %2254 = vmatpush3.bf16.msra.mxu0 %v2758_v40 }
 0x874   :  { %v571_v44 = vrot.slane %v569_v43, 2  ;;  %2283 = vmatprep.subr.bf16.mxu0 %v2606_v1  ;;  %2270 = vmatpush3.bf16.msra.mxu1 %v2733_v31 }
 0x875   :  { %2275 = vmatprep.subr.bf16.mxu1 %v2606_v1 }
 0x876   :  { %572 = vrot.lane.b32.xlu1 %v571_v44, %s2610_s4 }
 0x8da   :  { %v586_v45 = vpop.permute.xlu0 %585 }
 0x8db   :  { %v2896_v46 = vadd.f32 %v586_v45, %v2812_v28 }
 0x8dd   :  { %v727_v48 = vpack.c.bf16 %v2896_v46, %v2896_v46 }
 0x8df   :  { %729 = vrot.lane.b32.xlu0 %v727_v48, %s2610_s4 }
 0x8e8   :  { %v573_v59 = vpop.permute.xlu1 %572 }
 0x8e9   :  { %v2937_v42 = vadd.f32 %v573_v59, %v2851_v4 }
 0x941   :  { %v864_v49 = vpop.f32.mrb[12].mxu1 }
 0x942   :  { %v871_v50 = vrot.slane %v864_v49, 2  ;;  %v2265_v51 = vpop.f32.mrb[13].mxu1 }
 0x943   :  { %v867_v52 = vpop.f32.mrb[14].mxu1 }
 0x944   :  { %v873_v53 = vadd.f32 %v871_v50, %v2714_v11  ;;  %v2266_v54 = vpop.f32.mrb[15].mxu1 }
 0x946   :  { %2487 = vtanh.f32 %v873_v53  ;;  %v2076_v11 = vmul.f32 -1.442695, %v873_v53 }
 0x948   :  { %2489 = vpow2.f32 %v2076_v11 }
 0x950   :  { %v2488_v55 = vpop.eup %2487 }
 0x951   :  { %v730_v56 = vpop.permute.xlu0 %729  ;;  %886 = vrot.lane.b32.xlu1 %v2488_v55, %s2609_s23 }
 0x952   :  { %2256 = vmatmul.mubr.msk.bf16.vlgmr.msra.gmra.mrb[12].mxu0 %vm128_vm3, %v730_v56  ;;  %v2490_v57 = vpop.eup %2489 }
 0x953   :  { %2284 = vmatpush3.bf16.msra.mxu0 %v2678_v3  ;;  %2287 = vmatprep.mubr.msk.bf16.mxu0 %vm2607_vm1, %v2606_v1  ;;  %v877_v58 = vadd.f32 1.0, %v2490_v57 }
 0x954   :  { %2285 = vmatprep.subr.bf16.mxu0 %v2606_v1 }
 0x955   :  { %2491 = vrcp.f32 %v877_v58 }
 0x957   :  { %2286 = vmatpush3.bf16.msra.mxu0 %v2689_v5 }
 0x958   :  { %2291 = vmatprep.subr.bf16.mxu0 %v2606_v1 }
 0x95f   :  { %v2492_v60 = vpop.eup %2491 }
 0x960   :  { %v884_v16 = vmul.f32 %v2492_v60, %v882_v18 }
 0x9c3   :  { %v887_v61 = vpop.permute.xlu1 %886 }
 0x9c4   :  { %v889_v62 = vmul.f32 %v2492_v60, %v887_v61 }
 0x9c6   :  { %891 = vrot.lane.b32.xlu1 %v889_v62, %s2610_s4 }
 0xa25   :  { %v768_v0 = vpop.f32.mrb[12].mxu0 }
 0xa26   :  { %v2389_v2 = vadd.f32 %v2782_v47, %v768_v0  ;;  %v2257_v9 = vpop.f32.mrb[13].mxu0 }
 0xa27   :  { %v771_v12 = vpop.f32.mrb[14].mxu0 }
 0xa28   :  { %2493 = vtanh.f32 %v2389_v2  ;;  %v2258_v14 = vpop.f32.mrb[15].mxu0  ;;  %v2074_v21 = vmul.f32 -1.442695, %v2389_v2 }
 0xa32   :  { %v2494_v6 = vpop.eup %2493 }
 0xa33   :  { %784 = vrot.lane.b32.xlu0 %v2494_v6, %s2609_s23 }
 0xa38   :  { %v892_v17 = vpop.permute.xlu1 %891 }
 0xa39   :  { %v2923_v19 = vadd.f32 %v892_v17, %v884_v16 }
 0xa3b   :  { %2495 = vtanh.f32 %v2923_v19 }
 0xa3c   :  { %2497 = vpow2.f32 %v2074_v21 }
 0xa45   :  { %v2496_v20 = vpop.eup %2495 }
 0xa46   :  { %897 = vrot.lane.b32.xlu1 %v2496_v20, %s2609_s23  ;;  %v2498_v8 = vpop.eup %2497  ;;  %v38_v20 = vld [vmem:[%s3289_s0 + $0x8] sm:$0xff] }
 0xa47   :  { %v778_v22 = vadd.f32 1.0, %v2498_v8 }
 0xa49   :  { %2499 = vrcp.f32 %v778_v22 }
 0xa53   :  { %v2500_v23 = vpop.eup %2499 }
 0xa54   :  { %v782_v24 = vmul.f32 %v2500_v23, %v2937_v42 }
 0xaa5   :  { %v785_v25 = vpop.permute.xlu0 %784 }
 0xaa6   :  { %v787_v26 = vmul.f32 %v2500_v23, %v785_v25 }
 0xaa8   :  { %789 = vrot.lane.b32.xlu0 %v787_v26, %s2610_s4 }
 0xab8   :  { %v898_v27 = vpop.permute.xlu1 %897 }
 0xab9   :  { %v900_v34 = vmul.f32 %v2492_v60, %v898_v27 }
 0xabb   :  { %v910_v35 = vsub.f32 %v900_v34, %v908_v29 }
 0xabd   :  { %v911_v36 = vmul.f32 %v910_v35, %v2739_v33 }
 0xabf   :  { %v913_v37 = vrot.slane %v911_v36, 6 }
 0xac1   :  { %v2931_v39 = vadd.f32 %v913_v37, %v2870_v32 }
 0xac3   :  { %v916_v41 = vpack.c.bf16 %v2931_v39, %v2931_v39 }
 0xac5   :  { %918 = vrot.lane.b32.xlu1 %v916_v41, %s2610_s4 }
 0xb1a   :  { %v790_v43 = vpop.permute.xlu0 %789 }
 0xb1b   :  { %v792_v44 = vadd.f32 %v790_v43, %v782_v24 }
 0xb1d   :  { %2501 = vtanh.f32 %v792_v44  ;;  %v799_v45 = vsub.f32 %v792_v44, %v2937_v42 }
 0xb1f   :  { %v801_v48 = vrot.slane %v799_v45, 4 }
 0xb21   :  { %802 = vrot.lane.b32.xlu1 %v801_v48, %s2611_s14 }
 0xb27   :  { %v2502_v32 = vpop.eup %2501 }
 0xb28   :  { %795 = vrot.lane.b32.xlu0 %v2502_v32, %s2609_s23  ;;  %v901_v32 = vsub.f32 %v2923_v19, %v882_v18 }
 0xb37   :  { %v919_v49 = vpop.permute.xlu1 %918 }
 0xb38   :  { %2272 = vmatmul.mubr.msk.bf16.vlgmr.msra.gmra.mrb[16].mxu1 %vm128_vm3, %v919_v49  ;;  %2288 = vmatmul.mubr.msk.bf16.vlgmr.msra.gmra.mrb[16].mxu0 %vm128_vm3, %v919_v49  ;;  %v902_v49 = vmul.f32 %v901_v32, %v2739_v33 }
 0xb39   :  { %2276 = vmatpush3.bf16.msra.mxu1 %v2750_v38  ;;  %2279 = vmatprep.mubr.msk.bf16.mxu1 %vm2607_vm1, %v2606_v1 }
 0xb3a   :  { %2277 = vmatprep.subr.bf16.mxu1 %v2606_v1  ;;  %2292 = vmatpush3.bf16.msra.mxu0 %v2727_v30 }
 0xb3b   :  { %2293 = vmatprep.subr.bf16.mxu0 %v2606_v1  ;;  %2295 = vmatprep.mubr.msk.bf16.mxu0 %vm2607_vm1, %v2606_v1 }
 0xb3d   :  { %2278 = vmatpush3.bf16.msra.mxu1 %v2758_v40 }
 0xb3e   :  { %2307 = vmatprep.subr.bf16.mxu1 %v2606_v1  ;;  %2294 = vmatpush3.bf16.msra.mxu0 %v2733_v31 }
 0xb3f   :  { %2299 = vmatprep.subr.bf16.mxu0 %v2606_v1 }
 0xb93   :  { %v803_v4 = vpop.permute.xlu1 %802 }
 0xb94   :  { %v805_v50 = vmul.f32 %v803_v4, %v2739_v33  ;;  %v904_v4 = vrot.slane %v902_v49, 6 }
 0xb96   :  { %v807_v51 = vrot.slane %v805_v50, 4  ;;  %v2995_v50 = vadd.f32 %v904_v4, %v2917_v15 }
 0xb98   :  { %808 = vrot.lane.b32.xlu1 %v807_v51, %s2610_s4 }
 0xb9a   :  { %v796_v52 = vpop.permute.xlu0 %795 }
 0xb9b   :  { %v798_v53 = vmul.f32 %v2500_v23, %v796_v52 }
 0xb9d   :  { %v812_v54 = vsub.f32 %v798_v53, %v2896_v46 }
 0xb9f   :  { %v814_v55 = vrot.slane %v812_v54, 4 }
 0xba1   :  { %815 = vrot.lane.b32.xlu0 %v814_v55, %s2610_s4 }
 0xc0a   :  { %v809_v12 = vpop.permute.xlu1 %808 }
 0xc0b   :  { %v1100_v56 = vpop.f32.mrb[16].mxu0  ;;  %v2986_v24 = vadd.f32 %v809_v12, %v2937_v42 }
 0xc0c   :  { %v1106_v11 = vadd.f32 %v1100_v56, %v2716_v13  ;;  %v2289_v57 = vpop.f32.mrb[17].mxu0 }
 0xc0d   :  { %v1103_v58 = vpop.f32.mrb[18].mxu0 }
 0xc0e   :  { %2503 = vtanh.f32 %v1106_v11  ;;  %v2290_v59 = vpop.f32.mrb[19].mxu0  ;;  %v2081_v0 = vmul.f32 -1.442695, %v1106_v11 }
 0xc10   :  { %2505 = vpow2.f32 %v2081_v0 }
 0xc13   :  { %v816_v60 = vpop.permute.xlu0 %815 }
 0xc14   :  { %v818_v61 = vmul.f32 %v816_v60, %v2739_v33 }
 0xc16   :  { %v820_v62 = vrot.slane %v818_v61, 4 }
 0xc18   :  { %v2504_v63 = vpop.eup %2503  ;;  %821 = vrot.lane.b32.xlu0 %v820_v62, %s2611_s14 }
 0xc19   :  { %1116 = vrot.lane.b32.xlu1 %v2504_v63, %s2609_s23 }
 0xc1a   :  { %v2506_v2 = vpop.eup %2505 }
 0xc1b   :  { %v1110_v9 = vadd.f32 1.0, %v2506_v2 }
 0xc1d   :  { %2507 = vrcp.f32 %v1110_v9 }
 0xc27   :  { %v2508_v7 = vpop.eup %2507 }
 0xc28   :  { %v1114_v51 = vmul.f32 %v2508_v7, %v2995_v50 }
 0xc8a   :  { %v822_v14 = vpop.permute.xlu0 %821 }
 0xc8b   :  { %v2966_v10 = vadd.f32 %v822_v14, %v2896_v46  ;;  %v1117_v6 = vpop.permute.xlu1 %1116 }
 0xc8c   :  { %v1119_v16 = vmul.f32 %v2508_v7, %v1117_v6 }
 0xc8d   :  { %v963_v17 = vpack.c.bf16 %v2966_v10, %v2966_v10 }
 0xc8e   :  { %1121 = vrot.lane.b32.xlu1 %v1119_v16, %s2610_s4 }
 0xc8f   :  { %965 = vrot.lane.b32.xlu0 %v963_v17, %s2610_s4 }
 0xc92   :  { %1134 = vperm.xlu1 %2436, %v38_v20  }
 0xd00   :  { %v1122_v42 = vpop.permute.xlu1 %1121 }
 0xd01   :  { %v966_v21 = vpop.permute.xlu0 %965  ;;  %v2998_v52 = vadd.f32 %v1122_v42, %v1114_v51 }
 0xd02   :  { %2280 = vmatmul.mubr.msk.bf16.vlgmr.msra.gmra.mrb[16].mxu1 %vm128_vm3, %v966_v21 }
 0xd03   :  { %2308 = vmatpush3.bf16.msra.mxu1 %v2678_v3  ;;  %2311 = vmatprep.mubr.msk.bf16.mxu1 %vm2607_vm1, %v2606_v1  ;;  %v1131_v4 = vsub.f32 %v2998_v52, %v2995_v50 }
 0xd04   :  { %2309 = vmatprep.subr.bf16.mxu1 %v2606_v1 }
 0xd07   :  { %2310 = vmatpush3.bf16.msra.mxu1 %v2689_v5 }
 0xd08   :  { %2315 = vmatprep.subr.bf16.mxu1 %v2606_v1 }
 0xd11   :  { %v3007_v60 = vpop.permute.xlu1 %1134 }
 0xd12   :  { %v1137_v42 = vmul.f32 %v3007_v60, %v1131_v4 }
 0xdd5   :  { %v1004_v8 = vpop.f32.mrb[16].mxu1 }
 0xdd6   :  { %v2390_v22 = vadd.f32 %v2782_v47, %v1004_v8  ;;  %v2281_v23 = vpop.f32.mrb[17].mxu1 }
 0xdd7   :  { %v1007_v25 = vpop.f32.mrb[18].mxu1 }
 0xdd8   :  { %2509 = vtanh.f32 %v2390_v22  ;;  %v2282_v26 = vpop.f32.mrb[19].mxu1  ;;  %v2079_v29 = vmul.f32 -1.442695, %v2390_v22 }
 0xdda   :  { %2511 = vpow2.f32 %v2079_v29 }
 0xde2   :  { %v2510_v27 = vpop.eup %2509 }
 0xde3   :  { %1020 = vrot.lane.b32.xlu0 %v2510_v27, %s2609_s23 }
 0xde4   :  { %v2512_v34 = vpop.eup %2511 }
 0xde5   :  { %v1014_v35 = vadd.f32 1.0, %v2512_v34 }
 0xde7   :  { %2513 = vrcp.f32 %v1014_v35 }
 0xdf1   :  { %v2514_v36 = vpop.eup %2513 }
 0xdf2   :  { %v1018_v43 = vmul.f32 %v2514_v36, %v2986_v24 }
 0xe55   :  { %v1021_v37 = vpop.permute.xlu0 %1020 }
 0xe56   :  { %v1023_v41 = vmul.f32 %v2514_v36, %v1021_v37 }
 0xe58   :  { %1025 = vrot.lane.b32.xlu0 %v1023_v41, %s2610_s4 }
 0xeca   :  { %v1026_v44 = vpop.permute.xlu0 %1025 }
 0xecb   :  { %v1028_v45 = vadd.f32 %v1026_v44, %v1018_v43 }
 0xecd   :  { %2515 = vtanh.f32 %v1028_v45  ;;  %v1035_v9 = vsub.f32 %v1028_v45, %v2986_v24 }
 0xece   :  { %2517 = vtanh.f32 %v2998_v52 }
 0xecf   :  { %v1037_v14 = vrot.slane %v1035_v9, 2 }
 0xed7   :  { %v2516_v48 = vpop.eup %2515 }
 0xed8   :  { %1031 = vrot.lane.b32.xlu0 %v2516_v48, %s2609_s23  ;;  %v2518_v18 = vpop.eup %2517 }
 0xf4a   :  { %v1032_v53 = vpop.permute.xlu0 %1031 }
 0xf4b   :  { %v1034_v54 = vmul.f32 %v2514_v36, %v1032_v53 }
 0xf4d   :  { %v1048_v55 = vsub.f32 %v1034_v54, %v2966_v10 }
 0xf4f   :  { %v1050_v56 = vrot.slane %v1048_v55, 2  ;;  %v3057_v55 = vadd.f32 %v1137_v42, %v2995_v50 }
 0xf51   :  { %1051 = vrot.lane.b32.xlu0 %v1050_v56, %s2610_s4  ;;  %v1324_v56 = vrot.slane %v3057_v55, 6 }
 0xf55   :  { %1127 = vrot.lane.b32.xlu0 %v2518_v18, %s2609_s23 }
 0xfc3   :  { %v1052_v19 = vpop.permute.xlu0 %1051 }
 0xfc4   :  { %v1054_v15 = vmul.f32 %v1052_v19, %v2739_v33 }
 0xfc6   :  { %v1056_v11 = vrot.slane %v1054_v15, 6 }
 0xfc7   :  { %v1128_v57 = vpop.permute.xlu0 %1127 }
 0xfc8   :  { %v1130_v58 = vmul.f32 %v2508_v7, %v1128_v57  ;;  %1057 = vrot.lane.b32.xlu1 %v1056_v11, %s2611_s14 }
 0xfca   :  { %v1139_v59 = vsub.f32 %v1130_v58, %v2931_v39 }
 0xfcc   :  { %v1140_v61 = vmul.f32 %v1139_v59, %v3007_v60 }
 0xfce   :  { %v3011_v62 = vadd.f32 %v1140_v61, %v2931_v39 }
 0xfd0   :  { %v1142_v63 = vpack.c.bf16 %v3011_v62, %v3011_v62 }
 0xfd2   :  { %1144 = vrot.lane.b32.xlu0 %v1142_v63, %s2610_s4 }
0x103a   :  { %v1058_v0 = vpop.permute.xlu1 %1057 }
0x103b   :  { %v3017_v2 = vadd.f32 %v1058_v0, %v2966_v10  ;;  %v1350_v0 = vrot.slane %v3011_v62, 6 }
0x103d   :  { %v1189_v12 = vpack.c.bf16 %v3017_v2, %v3017_v2 }
0x103f   :  { %1191 = vrot.lane.b32.xlu1 %v1189_v12, %s2610_s4 }
0x1043   :  { %1038 = vrot.lane.b32.xlu1 %v1037_v14, %s2611_s14 }
0x1044   :  { %v1145_v39 = vpop.permute.xlu0 %1144 }
0x1045   :  { %2296 = vmatmul.mubr.msk.bf16.vlgmr.msra.gmra.mrb[20].mxu0 %vm128_vm3, %v1145_v39  ;;  %2312 = vmatmul.mubr.msk.bf16.vlgmr.msra.gmra.mrb[20].mxu1 %vm128_vm3, %v1145_v39 }
0x1046   :  { %2300 = vmatpush3.bf16.msra.mxu0 %v2750_v38  ;;  %2303 = vmatprep.mubr.msk.bf16.mxu0 %vm2607_vm1, %v2606_v1 }
0x1047   :  { %2301 = vmatprep.subr.bf16.mxu0 %v2606_v1  ;;  %2316 = vmatpush3.bf16.msra.mxu1 %v2727_v30 }
0x1048   :  { %2317 = vmatprep.subr.bf16.mxu1 %v2606_v1  ;;  %2319 = vmatprep.mubr.msk.bf16.mxu1 %vm2607_vm1, %v2606_v1 }
0x104a   :  { %2302 = vmatpush3.bf16.msra.mxu0 %v2758_v40 }
0x104b   :  { %2331 = vmatprep.subr.bf16.mxu0 %v2606_v1  ;;  %2318 = vmatpush3.bf16.msra.mxu1 %v2733_v31 }
0x104c   :  { %2323 = vmatprep.subr.bf16.mxu1 %v2606_v1 }
0x10b1   :  { %v1192_v7 = vpop.permute.xlu1 %1191 }
0x10b2   :  { %2304 = vmatmul.mubr.msk.bf16.vlgmr.msra.gmra.mrb[20].mxu0 %vm128_vm3, %v1192_v7 }
0x10b3   :  { %2332 = vmatpush3.bf16.msra.mxu0 %v2678_v3  ;;  %2335 = vmatprep.mubr.msk.bf16.mxu0 %vm2607_vm1, %v2606_v1 }
0x10b4   :  { %2333 = vmatprep.subr.bf16.mxu0 %v2606_v1 }
0x10b5   :  { %v1039_v35 = vpop.permute.xlu1 %1038 }
0x10b6   :  { %v1041_v36 = vmul.f32 %v1039_v35, %v2739_v33 }
0x10b7   :  { %2334 = vmatpush3.bf16.msra.mxu0 %v2689_v5 }
0x10b8   :  { %2339 = vmatprep.subr.bf16.mxu0 %v2606_v1  ;;  %v1043_v41 = vrot.slane %v1041_v36, 6 }
0x1118   :  { %v1306_v6 = vpop.f32.mrb[20].mxu1 }
0x1119   :  { %v1313_v16 = vrot.slane %v1306_v6, 6  ;;  %v2313_v17 = vpop.f32.mrb[21].mxu1 }
0x111a   :  { %v1309_v20 = vpop.f32.mrb[22].mxu1 }
0x111b   :  { %v1315_v21 = vadd.f32 %v1313_v16, %v2716_v13  ;;  %v2314_v8 = vpop.f32.mrb[23].mxu1 }
0x111d   :  { %2519 = vtanh.f32 %v1315_v21  ;;  %v2086_v3 = vmul.f32 -1.442695, %v1315_v21 }
0x111f   :  { %2521 = vpow2.f32 %v2086_v3 }
0x1127   :  { %v2520_v22 = vpop.eup %2519 }
0x1128   :  { %1328 = vrot.lane.b32.xlu0 %v2520_v22, %s2609_s23 }
0x1129   :  { %v2522_v29 = vpop.eup %2521 }
0x112a   :  { %v1319_v34 = vadd.f32 1.0, %v2522_v29 }
0x1185   :  { %v1230_v23 = vpop.f32.mrb[20].mxu0 }
0x1186   :  { %v2391_v25 = vadd.f32 %v2782_v47, %v1230_v23  ;;  %v2305_v26 = vpop.f32.mrb[21].mxu0 }
0x1187   :  { %v1233_v5 = vpop.f32.mrb[22].mxu0 }
0x1188   :  { %2523 = vtanh.f32 %v2391_v25  ;;  %v2306_v27 = vpop.f32.mrb[23].mxu0  ;;  %v2084_v48 = vmul.f32 -1.442695, %v2391_v25 }
0x1189   :  { %2525 = vrcp.f32 %v1319_v34 }
0x118a   :  { %2527 = vpow2.f32 %v2084_v48 }
0x1192   :  { %v2524_v37 = vpop.eup %2523 }
0x1193   :  { %1246 = vrot.lane.b32.xlu0 %v2524_v37, %s2609_s23  ;;  %v2526_v43 = vpop.eup %2525 }
0x1194   :  { %v2528_v32 = vpop.eup %2527  ;;  %v1326_v18 = vmul.f32 %v2526_v43, %v1324_v56 }
0x1195   :  { %v1240_v49 = vadd.f32 1.0, %v2528_v32 }
0x1197   :  { %1044 = vrot.lane.b32.xlu0 %v1043_v41, %s2610_s4  ;;  %2529 = vrcp.f32 %v1240_v49 }
0x119a   :  { %v1329_v44 = vpop.permute.xlu0 %1328 }
0x119b   :  { %v1331_v45 = vmul.f32 %v2526_v43, %v1329_v44 }
0x119d   :  { %1333 = vrot.lane.b32.xlu1 %v1331_v45, %s2610_s4 }
0x11a1   :  { %v2530_v51 = vpop.eup %2529 }
0x1205   :  { %v1247_v53 = vpop.permute.xlu0 %1246 }
0x1206   :  { %v1249_v54 = vmul.f32 %v2530_v51, %v1247_v53 }
0x1208   :  { %1251 = vrot.lane.b32.xlu1 %v1249_v54, %s2610_s4 }
0x1209   :  { %v1045_v11 = vpop.permute.xlu0 %1044 }
0x120a   :  { %v3067_v57 = vadd.f32 %v1045_v11, %v2986_v24 }
0x120c   :  { %v1244_v50 = vmul.f32 %v2530_v51, %v3067_v57 }
0x120f   :  { %v1334_v19 = vpop.permute.xlu1 %1333 }
0x1210   :  { %v3062_v15 = vadd.f32 %v1334_v19, %v1326_v18 }
0x1212   :  { %2531 = vtanh.f32 %v3062_v15  ;;  %v1343_v54 = vsub.f32 %v3062_v15, %v1324_v56 }
0x1214   :  { %v1344_v18 = vmul.f32 %v1343_v54, %v3007_v60 }
0x121c   :  { %v2532_v52 = vpop.eup %2531 }
0x121d   :  { %1339 = vrot.lane.b32.xlu0 %v2532_v52, %s2609_s23  ;;  %v1346_v52 = vrot.slane %v1344_v18, 2 }
0x127a   :  { %v1252_v58 = vpop.permute.xlu1 %1251 }
0x127b   :  { %v3070_v59 = vadd.f32 %v1252_v58, %v1244_v50  ;;  %v3132_v58 = vadd.f32 %v1346_v52, %v3057_v55 }
0x127d   :  { %2533 = vtanh.f32 %v3070_v59  ;;  %v1261_v19 = vsub.f32 %v3070_v59, %v3067_v57  ;;  %v1560_v56 = vrot.slane %v3132_v58, 4 }
0x127f   :  { %v1262_v11 = vmul.f32 %v1261_v19, %v3007_v60 }
0x1281   :  { %v3129_v50 = vadd.f32 %v1262_v11, %v3067_v57 }
0x1287   :  { %v2534_v61 = vpop.eup %2533 }
0x1288   :  { %1257 = vrot.lane.b32.xlu1 %v2534_v61, %s2609_s23 }
0x128f   :  { %v1340_v63 = vpop.permute.xlu0 %1339 }
0x1290   :  { %v1342_v9 = vmul.f32 %v2526_v43, %v1340_v63 }
0x1292   :  { %v1352_v12 = vsub.f32 %v1342_v9, %v1350_v0 }
0x1294   :  { %v1353_v14 = vmul.f32 %v1352_v12, %v3007_v60 }
0x1296   :  { %v1355_v39 = vrot.slane %v1353_v14, 2 }
0x1298   :  { %v3077_v24 = vadd.f32 %v1355_v39, %v3011_v62 }
0x129a   :  { %v1358_v7 = vpack.c.bf16 %v3077_v24, %v3077_v24 }
0x129c   :  { %1360 = vrot.lane.b32.xlu0 %v1358_v7, %s2610_s4 }
0x12fa   :  { %v1258_v6 = vpop.permute.xlu1 %1257 }
0x12fb   :  { %v1260_v16 = vmul.f32 %v2530_v51, %v1258_v6 }
0x12fd   :  { %v1264_v17 = vsub.f32 %v1260_v16, %v3017_v2  ;;  %v1586_v16 = vrot.slane %v3077_v24, 4 }
0x12ff   :  { %v1265_v20 = vmul.f32 %v1264_v17, %v3007_v60 }
0x1301   :  { %v3085_v21 = vadd.f32 %v1265_v20, %v3017_v2 }
0x1303   :  { %v1405_v8 = vpack.c.bf16 %v3085_v21, %v3085_v21 }
0x1305   :  { %1407 = vrot.lane.b32.xlu1 %v1405_v8, %s2610_s4 }
0x130e   :  { %v1361_v62 = vpop.permute.xlu0 %1360 }
0x130f   :  { %2320 = vmatmul.mubr.msk.bf16.vlgmr.msra.gmra.mrb[24].mxu1 %vm128_vm3, %v1361_v62  ;;  %2336 = vmatmul.mubr.msk.bf16.vlgmr.msra.gmra.mrb[24].mxu0 %vm128_vm3, %v1361_v62 }
0x1310   :  { %2324 = vmatpush3.bf16.msra.mxu1 %v2750_v38  ;;  %2327 = vmatprep.mubr.msk.bf16.mxu1 %vm2607_vm1, %v2606_v1 }
0x1311   :  { %2325 = vmatprep.subr.bf16.mxu1 %v2606_v1  ;;  %2340 = vmatpush3.bf16.msra.mxu0 %v2727_v30  ;;  %v2575_v30 = vld [vmem:[%s3292_s3] sm:$0xff]  }
0x1312   :  { %2341 = vmatprep.subr.bf16.mxu0 %v2606_v1  ;;  %2343 = vmatprep.mubr.msk.bf16.mxu0 %vm2607_vm1, %v2606_v1 }
0x1314   :  { %2326 = vmatpush3.bf16.msra.mxu1 %v2758_v40  ;;  %v2576_v40 = vld [vmem:[%s3292_s3 + $0x8] sm:$0xff]  }
0x1315   :  { %2355 = vmatprep.subr.bf16.mxu1 %v2606_v1  ;;  %2342 = vmatpush3.bf16.msra.mxu0 %v2733_v31 }
0x1316   :  { %2347 = vmatprep.subr.bf16.mxu0 %v2606_v1 }
0x1377   :  { %v1408_v38 = vpop.permute.xlu1 %1407 }
0x1378   :  { %2328 = vmatmul.mubr.msk.bf16.vlgmr.msra.gmra.mrb[24].mxu1 %vm128_vm3, %v1408_v38 }
0x1379   :  { %2356 = vmatpush3.bf16.msra.mxu1 %v2575_v30  ;;  %2359 = vmatprep.mubr.msk.bf16.mxu1 %vm2607_vm1, %v2606_v1 }
0x137a   :  { %2357 = vmatprep.subr.bf16.mxu1 %v2606_v1 }
0x137d   :  { %2358 = vmatpush3.bf16.msra.mxu1 %v2576_v40 }
0x137e   :  { %2363 = vmatprep.subr.bf16.mxu1 %v2606_v1 }
0x13e2   :  { %v1542_v31 = vpop.f32.mrb[24].mxu0 }
0x13e3   :  { %v2337_v22 = vpop.f32.mrb[25].mxu0  ;;  %v1549_v25 = vrot.slane %v1542_v31, 4 }
0x13e4   :  { %v1545_v3 = vpop.f32.mrb[26].mxu0 }
0x13e5   :  { %v2338_v23 = vpop.f32.mrb[27].mxu0  ;;  %v1551_v34 = vadd.f32 %v1549_v25, %v2716_v13 }
0x13e7   :  { %v2091_v43 = vmul.f32 -1.442695, %v1551_v34 }
0x144b   :  { %v1446_v26 = vpop.f32.mrb[24].mxu1 }
0x144c   :  { %v2392_v5 = vadd.f32 %v2782_v47, %v1446_v26  ;;  %v2329_v27 = vpop.f32.mrb[25].mxu1  ;;  %v2578_v26 = vld [vmem:[%s3294_s5] sm:$0xff]  }
0x144d   :  { %v1449_v29 = vpop.f32.mrb[26].mxu1 }
0x144e   :  { %2535 = vtanh.f32 %v2392_v5  ;;  %v2330_v35 = vpop.f32.mrb[27].mxu1  ;;  %v2089_v41 = vmul.f32 -1.442695, %v2392_v5  ;;  %v3178_v29 = vld [vmem:[%s3295_s6 + $0x8] sm:$0xff]  }
0x144f   :  { %2537 = vtanh.f32 %v1551_v34  ;;  %v2580_v35 = vld [vmem:[%s3294_s5 + $0x8] sm:$0xff]  }
0x1450   :  { %2539 = vpow2.f32 %v2089_v41 }
0x1451   :  { %2541 = vpow2.f32 %v2091_v43 }
0x1458   :  { %v2536_v36 = vpop.eup %2535 }
0x1459   :  { %1462 = vrot.lane.b32.xlu0 %v2536_v36, %s2609_s23  ;;  %v2538_v37 = vpop.eup %2537 }
0x145a   :  { %v2540_v44 = vpop.eup %2539 }
0x145b   :  { %v1456_v45 = vadd.f32 1.0, %v2540_v44  ;;  %v2542_v47 = vpop.eup %2541 }
0x145c   :  { %v1555_v48 = vadd.f32 1.0, %v2542_v47 }
0x145d   :  { %1564 = vrot.lane.b32.xlu0 %v2538_v37, %s2609_s23  ;;  %2543 = vrcp.f32 %v1456_v45 }
0x145e   :  { %2545 = vrcp.f32 %v1555_v48 }
0x1467   :  { %v2544_v32 = vpop.eup %2543 }
0x1468   :  { %v2546_v42 = vpop.eup %2545  ;;  %v1460_v61 = vmul.f32 %v2544_v32, %v3129_v50 }
0x1469   :  { %v1562_v15 = vmul.f32 %v2546_v42, %v1560_v56 }
0x14cb   :  { %v1463_v49 = vpop.permute.xlu0 %1462 }
0x14cc   :  { %v1465_v4 = vmul.f32 %v2544_v32, %v1463_v49 }
0x14ce   :  { %1467 = vrot.lane.b32.xlu1 %v1465_v4, %s2610_s4 }
0x14cf   :  { %v1565_v51 = vpop.permute.xlu0 %1564 }
0x14d0   :  { %v1567_v53 = vmul.f32 %v2546_v42, %v1565_v51 }
0x14d2   :  { %1569 = vrot.lane.b32.xlu0 %v1567_v53, %s2610_s4 }
0x1540   :  { %v1468_v63 = vpop.permute.xlu1 %1467 }
0x1541   :  { %v1470_v0 = vadd.f32 %v1468_v63, %v1460_v61  ;;  %v3205_v61 = vld [vmem:[%s3296_s7] ss:$0 sm:$0xff] }
0x1543   :  { %2547 = vtanh.f32 %v1470_v0  ;;  %v1477_v30 = vsub.f32 %v1470_v0, %v3129_v50 }
0x1544   :  { %v1570_v59 = vpop.permute.xlu0 %1569 }
0x1545   :  { %v3138_v9 = vadd.f32 %v1570_v59, %v1562_v15  ;;  %v1479_v31 = vrot.slane %v1477_v30, 6 }
0x1547   :  { %2549 = vtanh.f32 %v3138_v9  ;;  %v1579_v52 = vsub.f32 %v3138_v9, %v1560_v56 }
0x154d   :  { %v2548_v57 = vpop.eup %2547 }
0x154e   :  { %1473 = vrot.lane.b32.xlu1 %v2548_v57, %s2609_s23  ;;  %v1580_v57 = vmul.f32 %v1579_v52, %v3007_v60 }
0x1551   :  { %v2550_v55 = vpop.eup %2549 }
0x1552   :  { %1575 = vrot.lane.b32.xlu0 %v2550_v55, %s2609_s23  ;;  %v1582_v55 = vrot.slane %v1580_v57, 4 }
0x15c0   :  { %v1474_v12 = vpop.permute.xlu1 %1473 }
0x15c1   :  { %v1476_v14 = vmul.f32 %v2544_v32, %v1474_v12  ;;  %v1584_v12 = vadd.f32 %v1582_v55, %v3132_v58 }
0x15c3   :  { %v1490_v39 = vsub.f32 %v1476_v14, %v3085_v21  ;;  %v1796_v56 = vrot.slane %v1584_v12, 2 }
0x15c4   :  { %v1576_v7 = vpop.permute.xlu0 %1575 }
0x15c5   :  { %v1492_v6 = vrot.slane %v1490_v39, 6  ;;  %v1578_v17 = vmul.f32 %v2546_v42, %v1576_v7 }
0x15c7   :  { %v1588_v20 = vsub.f32 %v1578_v17, %v1586_v16  ;;  %1493 = vrot.lane.b32.xlu1 %v1492_v6, %s2610_s4 }
0x15c9   :  { %v1589_v8 = vmul.f32 %v1588_v20, %v3007_v60 }
0x15cb   :  { %v1591_v62 = vrot.slane %v1589_v8, 4 }
0x15cd   :  { %v3148_v38 = vadd.f32 %v1591_v62, %v3077_v24  ;;  %v3162_v24 = vld [vmem:[%s3295_s6] sm:$0xff]  }
0x15cf   :  { %v1594_v40 = vpack.c.bf16 %v3148_v38, %v3148_v38 }
0x15d1   :  { %1596 = vrot.lane.b32.xlu0 %v1594_v40, %s2610_s4  ;;  %v1816_v40 = vrot.slane %v3148_v38, 2 }
0x15d5   :  { %1480 = vrot.lane.b32.xlu0 %v1479_v31, %s2611_s14 }
0x1639   :  { %v1494_v22 = vpop.permute.xlu1 %1493 }
0x163a   :  { %v1496_v3 = vmul.f32 %v1494_v22, %v3007_v60 }
0x163c   :  { %v1498_v23 = vrot.slane %v1496_v3, 2 }
0x163e   :  { %1499 = vrot.lane.b32.xlu1 %v1498_v23, %s2611_s14 }
0x1643   :  { %v1597_v25 = vpop.permute.xlu0 %1596 }
0x1644   :  { %2344 = vmatmul.mubr.msk.bf16.vlgmr.msra.gmra.mrb[28].mxu0 %vm128_vm3, %v1597_v25  ;;  %2360 = vmatmul.mubr.msk.bf16.vlgmr.msra.gmra.mrb[28].mxu1 %vm128_vm3, %v1597_v25 }
0x1645   :  { %2348 = vmatpush3.bf16.msra.mxu0 %v3162_v24  ;;  %2351 = vmatprep.mubr.msk.bf16.mxu0 %vm2607_vm1, %v2606_v1 }
0x1646   :  { %2349 = vmatprep.subr.bf16.mxu0 %v2606_v1  ;;  %2364 = vmatpush3.bf16.msra.mxu1 %v2578_v26 }
0x1647   :  { %v1481_v5 = vpop.permute.xlu0 %1480  ;;  %2365 = vmatprep.subr.bf16.mxu1 %v2606_v1  ;;  %2367 = vmatprep.mubr.msk.bf16.mxu1 %vm2607_vm1, %v2606_v1 }
0x1648   :  { %v1483_v27 = vmul.f32 %v1481_v5, %v3007_v60 }
0x1649   :  { %2350 = vmatpush3.bf16.msra.mxu0 %v3178_v29 }
0x164a   :  { %v1485_v34 = vrot.slane %v1483_v27, 2  ;;  %2366 = vmatpush3.bf16.msra.mxu1 %v2580_v35  ;;  %2379 = vmatprep.subr.bf16.mxu0 %v2606_v1 }
0x164b   :  { %2371 = vmatprep.subr.bf16.mxu1 %v2606_v1 }
0x164c   :  { %1486 = vrot.lane.b32.xlu0 %v1485_v34, %s2610_s4 }
0x16b0   :  { %v1500_v36 = vpop.permute.xlu1 %1499 }
0x16b1   :  { %v3188_v37 = vadd.f32 %v1500_v36, %v3085_v21 }
0x16b3   :  { %v1641_v41 = vpack.c.bf16 %v3188_v37, %v3188_v37 }
0x16b5   :  { %1643 = vrot.lane.b32.xlu1 %v1641_v41, %s2610_s4 }
0x16be   :  { %v1487_v54 = vpop.permute.xlu0 %1486 }
0x16bf   :  { %v1489_v5 = vadd.f32 %v1487_v54, %v3129_v50 }
0x1717   :  { %v1778_v43 = vpop.f32.mrb[28].mxu1 }
0x1718   :  { %v1785_v44 = vrot.slane %v1778_v43, 2  ;;  %v2361_v45 = vpop.f32.mrb[29].mxu1 }
0x1719   :  { %v1781_v47 = vpop.f32.mrb[30].mxu1 }
0x171a   :  { %v1787_v48 = vadd.f32 %v1785_v44, %v2716_v13  ;;  %v2362_v32 = vpop.f32.mrb[31].mxu1 }
0x171c   :  { %2551 = vtanh.f32 %v1787_v48  ;;  %v2096_v42 = vmul.f32 -1.442695, %v1787_v48 }
0x171e   :  { %2553 = vpow2.f32 %v2096_v42 }
0x1726   :  { %v2552_v49 = vpop.eup %2551 }
0x1727   :  { %v1644_v4 = vpop.permute.xlu1 %1643  ;;  %1800 = vrot.lane.b32.xlu0 %v2552_v49, %s2609_s23 }
0x1728   :  { %2352 = vmatmul.mubr.msk.bf16.vlgmr.msra.gmra.mrb[28].mxu0 %vm128_vm3, %v1644_v4  ;;  %v2554_v51 = vpop.eup %2553 }
0x1729   :  { %2383 = vmatprep.mubr.msk.bf16.mxu0 %vm2607_vm1, %v2606_v1  ;;  %v1791_v53 = vadd.f32 1.0, %v2554_v51 }
0x172b   :  { %2555 = vrcp.f32 %v1791_v53 }
0x1735   :  { %v2556_v18 = vpop.eup %2555 }
0x1736   :  { %v1798_v9 = vmul.f32 %v2556_v18, %v1796_v56 }
0x1799   :  { %v1801_v19 = vpop.permute.xlu0 %1800 }
0x179a   :  { %v1803_v13 = vmul.f32 %v2556_v18, %v1801_v19 }
0x179c   :  { %1805 = vrot.lane.b32.xlu0 %v1803_v13, %s2610_s4 }
0x17fb   :  { %v1682_v11 = vpop.f32.mrb[28].mxu0 }
0x17fc   :  { %v2393_v63 = vadd.f32 %v3205_v61, %v1682_v11  ;;  %v2353_v0 = vpop.f32.mrb[29].mxu0 }
0x17fd   :  { %v1685_v15 = vpop.f32.mrb[30].mxu0 }
0x17fe   :  { %2557 = vtanh.f32 %v2393_v63  ;;  %v2354_v59 = vpop.f32.mrb[31].mxu0  ;;  %v2094_v16 = vmul.f32 -1.442695, %v2393_v63 }
0x1808   :  { %v2558_v14 = vpop.eup %2557 }
0x1809   :  { %1698 = vrot.lane.b32.xlu1 %v2558_v14, %s2609_s23 }
0x180e   :  { %v1806_v39 = vpop.permute.xlu0 %1805 }
0x180f   :  { %v1808_v7 = vadd.f32 %v1806_v39, %v1798_v9 }
0x1811   :  { %2559 = vtanh.f32 %v1808_v7 }
0x1812   :  { %2561 = vpow2.f32 %v2094_v16 }
0x181b   :  { %v2560_v6 = vpop.eup %2559 }
0x181c   :  { %1811 = vrot.lane.b32.xlu0 %v2560_v6, %s2609_s23  ;;  %v2562_v17 = vpop.eup %2561 }
0x181d   :  { %v1692_v20 = vadd.f32 1.0, %v2562_v17 }
0x181f   :  { %2563 = vrcp.f32 %v1692_v20 }
0x1829   :  { %v2564_v8 = vpop.eup %2563 }
0x182a   :  { %v1696_v27 = vmul.f32 %v2564_v8, %v1489_v5 }
0x187b   :  { %v1699_v62 = vpop.permute.xlu1 %1698 }
0x187c   :  { %v1701_v30 = vmul.f32 %v2564_v8, %v1699_v62 }
0x187e   :  { %1703 = vrot.lane.b32.xlu1 %v1701_v30, %s2610_s4 }
0x188e   :  { %v1812_v58 = vpop.permute.xlu0 %1811 }
0x188f   :  { %v1814_v31 = vmul.f32 %v2556_v18, %v1812_v58 }
0x1891   :  { %v1818_v22 = vsub.f32 %v1814_v31, %v1816_v40 }
0x1893   :  { %v1819_v3 = vmul.f32 %v1818_v22, %v3007_v60 }
0x1895   :  { %v1821_v23 = vrot.slane %v1819_v3, 6 }
0x1897   :  { %v1823_v25 = vadd.f32 %v1821_v23, %v3148_v38 }
0x1899   :  { %v1824_v26 = vpack.c.bf16 %v1823_v25, %v1823_v25 }
0x189b   :  { %1826 = vrot.lane.b32.xlu0 %v1824_v26, %s2610_s4 }
0x18f0   :  { %v1704_v34 = vpop.permute.xlu1 %1703 }
0x18f1   :  { %v1706_v35 = vadd.f32 %v1704_v34, %v1696_v27  ;;  %v2100_v34 = vld [vmem:[%s3298_s9] ss:$0 sm:$0xff] }
0x18f3   :  { %2565 = vtanh.f32 %v1706_v35  ;;  %v1713_v36 = vsub.f32 %v1706_v35, %v1489_v5 }
0x18f5   :  { %v1715_v41 = vrot.slane %v1713_v36, 4 }
0x18f7   :  { %1716 = vrot.lane.b32.xlu0 %v1715_v41, %s2611_s14 }
0x18fd   :  { %v2566_v43 = vpop.eup %2565 }
0x18fe   :  { %1709 = vrot.lane.b32.xlu1 %v2566_v43, %s2609_s23 }
0x190d   :  { %v1827_v44 = vpop.permute.xlu0 %1826 }
0x190e   :  { %2368 = vmatmul.mubr.msk.bf16.vlgmr.msra.gmra.mrb[32].mxu1 %vm128_vm3, %v1827_v44 }
0x190f   :  { %2372 = vmatpush3.bf16.msra.mxu1 %v3162_v24  ;;  %2375 = vmatprep.mubr.msk.bf16.mxu1 %vm2607_vm1, %v2606_v1 }
0x1910   :  { %2373 = vmatprep.subr.bf16.mxu1 %v2606_v1 }
0x1913   :  { %2374 = vmatpush3.bf16.msra.mxu1 %v3178_v29 }
0x1969   :  { %v1717_v50 = vpop.permute.xlu0 %1716 }
0x196a   :  { %v1719_v38 = vmul.f32 %v1717_v50, %v3007_v60 }
0x196c   :  { %v1721_v45 = vrot.slane %v1719_v38, 4 }
0x196e   :  { %1722 = vrot.lane.b32.xlu0 %v1721_v45, %s2610_s4 }
0x1970   :  { %v1710_v47 = vpop.permute.xlu1 %1709 }
0x1971   :  { %v1712_v48 = vmul.f32 %v2564_v8, %v1710_v47 }
0x1973   :  { %v1726_v32 = vsub.f32 %v1712_v48, %v3188_v37 }
0x1975   :  { %v1728_v49 = vrot.slane %v1726_v32, 4 }
0x1977   :  { %1729 = vrot.lane.b32.xlu1 %v1728_v49, %s2610_s4 }
0x19e0   :  { %v1723_v14 = vpop.permute.xlu0 %1722 }
0x19e1   :  { %v1725_v56 = vadd.f32 %v1723_v14, %v1489_v5 }
0x19e9   :  { %v1730_v24 = vpop.permute.xlu1 %1729 }
0x19ea   :  { %v1732_v4 = vmul.f32 %v1730_v24, %v3007_v60 }
0x19ec   :  { %v1734_v42 = vrot.slane %v1732_v4, 4 }
0x19ee   :  { %1735 = vrot.lane.b32.xlu1 %v1734_v42, %s2611_s14 }
0x1a60   :  { %v1736_v29 = vpop.permute.xlu1 %1735 }
0x1a61   :  { %v1738_v51 = vadd.f32 %v1736_v29, %v3188_v37 }
0x1a63   :  { %v1871_v53 = vpack.c.bf16 %v1738_v51, %v1738_v51 }
0x1a65   :  { %1873 = vrot.lane.b32.xlu1 %v1871_v53, %s2610_s4 }
0x1ad7   :  { %v1874_v54 = vpop.permute.xlu1 %1873 }
0x1ad8   :  { %2376 = vmatmul.mubr.msk.bf16.vlgmr.msra.gmra.mrb[32].mxu1 %vm128_vm3, %v1874_v54 }
0x1bab   :  { %v1912_v18 = vpop.f32.mrb[32].mxu1 }
0x1bac   :  { %v2394_v19 = vadd.f32 %v3205_v61, %v1912_v18  ;;  %v2377_v13 = vpop.f32.mrb[33].mxu1 }
0x1bad   :  { %v1915_v52 = vpop.f32.mrb[34].mxu1 }
0x1bae   :  { %2567 = vtanh.f32 %v2394_v19  ;;  %v2378_v11 = vpop.f32.mrb[35].mxu1  ;;  %v2099_v0 = vmul.f32 -1.442695, %v2394_v19 }
0x1bb0   :  { %2569 = vpow2.f32 %v2099_v0 }
0x1bb8   :  { %v2568_v63 = vpop.eup %2567 }
0x1bb9   :  { %1928 = vrot.lane.b32.xlu1 %v2568_v63, %s2609_s23 }
0x1bba   :  { %v2570_v15 = vpop.eup %2569 }
0x1bbb   :  { %v1922_v59 = vadd.f32 1.0, %v2570_v15 }
0x1bbd   :  { %2571 = vrcp.f32 %v1922_v59 }
0x1bc7   :  { %v2572_v57 = vpop.eup %2571 }
0x1bc8   :  { %v1926_v61 = vmul.f32 %v2572_v57, %v1725_v56 }
0x1c2b   :  { %v1929_v55 = vpop.permute.xlu1 %1928 }
0x1c2c   :  { %v1931_v12 = vmul.f32 %v2572_v57, %v1929_v55 }
0x1c2e   :  { %1933 = vrot.lane.b32.xlu1 %v1931_v12, %s2610_s4 }
0x1ca0   :  { %v1934_v9 = vpop.permute.xlu1 %1933 }
0x1ca1   :  { %v1936_v39 = vadd.f32 %v1934_v9, %v1926_v61 }
0x1ca3   :  { %2573 = vtanh.f32 %v1936_v39 }
0x1cad   :  { %v2574_v7 = vpop.eup %2573 }
0x1cae   :  { %1939 = vrot.lane.b32.xlu0 %v2574_v7, %s2609_s23 }
0x1d20   :  { %v1940_v6 = vpop.permute.xlu0 %1939 }
0x1d21   :  { %v1942_v16 = vmul.f32 %v2572_v57, %v1940_v6 }
0x1d23   :  { %v1943_v17 = vsub.f32 %v1942_v16, %v1738_v51 }
0x1d25   :  { %v1945_v20 = vrot.slane %v1943_v17, 2 }
0x1d27   :  { %1946 = vrot.lane.b32.xlu1 %v1945_v20, %s2610_s4 }
0x1d2b   :  { %353 = vrot.lane.b32.xlu1 %v2812_v28, %s2610_s4 }
0x1d2f   :  { %826 = vrot.lane.b32.xlu1 %v2966_v10, %s2610_s4 }
0x1d33   :  { %1268 = vrot.lane.b32.xlu1 %v3085_v21, %s2610_s4  ;;  %v2445_v21 = vld [vmem:[%s3297_s8] sm:$0xff]  }
0x1d34   :  { %2380 = vmatpush3.bf16.msra.mxu0 %v2445_v21 }
0x1d35   :  { %2381 = vmatprep.subr.bf16.mxu0 %v2606_v1 }
0x1d37   :  { %1740 = vrot.lane.b32.xlu1 %v1738_v51, %s2610_s4 }
0x1d99   :  { %v1947_v8 = vpop.permute.xlu1 %1946 }
0x1d9a   :  { %v1949_v62 = vmul.f32 %v1947_v8, %v3007_v60 }
0x1d9c   :  { %v1951_v30 = vrot.slane %v1949_v62, 6 }
0x1d9d   :  { %v354_v58 = vpop.permute.xlu1 %353 }
0x1d9e   :  { %357 = vst.msk [vmem:[#allocation2] sm:$0x3] %vm356_vm4, %v354_v58  ;;  %1952 = vrot.lane.b32.xlu0 %v1951_v30, %s2611_s14 }
0x1da1   :  { %v827_v40 = vpop.permute.xlu1 %826 }
0x1da2   :  { %829 = vst.msk [vmem:[#allocation2 + $0x4] sm:$0x3] %vm356_vm4, %v827_v40  ;;  %590 = vrot.lane.b32.xlu0 %v2896_v46, %s2610_s4  ;;  %v2446_v46 = vld [vmem:[%s3297_s8 + $0x8] sm:$0xff]  }
0x1da3   :  { %2382 = vmatpush3.bf16.msra.mxu0 %v2446_v46 }
0x1da5   :  { %v1269_v28 = vpop.permute.xlu1 %1268 }
0x1da6   :  { %1271 = vst.msk [vmem:[#allocation2 + $0x8] sm:$0x3] %vm356_vm4, %v1269_v28  ;;  %1062 = vrot.lane.b32.xlu0 %v3017_v2, %s2610_s4 }
0x1da9   :  { %v1741_v10 = vpop.permute.xlu1 %1740 }
0x1daa   :  { %1743 = vst.msk [vmem:[#allocation2 + $0xc] sm:$0x3] %vm356_vm4, %v1741_v10  ;;  %1504 = vrot.lane.b32.xlu0 %v3188_v37, %s2610_s4 }
0x1e10   :  { %v1953_v31 = vpop.permute.xlu0 %1952 }
0x1e11   :  { %v1955_v2 = vadd.f32 %v1953_v31, %v1738_v51 }
0x1e13   :  { %1957 = vrot.lane.b32.xlu0 %v1955_v2, %s2610_s4 }
0x1e14   :  { %v591_v22 = vpop.permute.xlu0 %590 }
0x1e15   :  { %593 = vst.msk [vmem:[#allocation2 + $0x2] sm:$0x3] %vm356_vm4, %v591_v22 }
0x1e18   :  { %v1063_v37 = vpop.permute.xlu0 %1062 }
0x1e19   :  { %1065 = vst.msk [vmem:[#allocation2 + $0x6] sm:$0x3] %vm356_vm4, %v1063_v37 }
0x1e1c   :  { %v1505_v3 = vpop.permute.xlu0 %1504 }
0x1e1d   :  { %1507 = vst.msk [vmem:[#allocation2 + $0xa] sm:$0x3] %vm356_vm4, %v1505_v3 }
0x1e20   :  { %v1961_v25 = vld [vmem:[#allocation2] sm:$0xff] }
0x1e21   :  { %v1963_v1 = vmul.f32 %v1961_v25, %v2739_v33 }
0x1e85   :  { %v1958_v23 = vpop.permute.xlu0 %1957 }
0x1e86   :  { %1960 = vst.msk [vmem:[#allocation2 + $0xe] sm:$0x3] %vm356_vm4, %v1958_v23 }
0x1e8d   :  { %v1962_v26 = vld [vmem:[#allocation2 + $0x8] sm:$0xff] }
0x1e8e   :  { %v1964_v5 = vmul.f32 %v1962_v26, %v3007_v60 }
0x1e90   :  { %v1965_v27 = vpack.c.bf16 %v1964_v5, %v1963_v1 }
0x1e92   :  { %2384 = vmatmul.mubr.msk.bf16.vlgmr.msra.gmra.mrb[32].mxu0 %vm128_vm3, %v1965_v27 }
0x1f65   :  { %v2026_v35 = vpop.f32.mrb[32].mxu0 }
0x1f66   :  { %v2027_v36 = vadd.f32 %v2100_v34, %v2026_v35  ;;  %v2385_v41 = vpop.f32.mrb[33].mxu0 }
0x1f67   :  { %v2029_v43 = vpop.f32.mrb[34].mxu0 }
0x1f68   :  { %2034 = vst.msk [vmem:[#allocation3] sm:$0xff] %vm2033_vm5, %v2027_v36  ;;  %v2030_v44 = vadd.f32 %v2100_v34, %v2029_v43  ;;  %v2386_v33 = vpop.f32.mrb[35].mxu0 }
0x1f6a   :  { %2035 = vst.msk [vmem:[#allocation3 + $0x8] sm:$0xff] %vm2033_vm5, %v2030_v44 }
0x1f6b   :  { %2593 = shalt.err (!%p2590_p4)
}
0x1f6c   :  { %s2594_s12 = scalar_lea.hbm %s3299_s10, 256 }
0x1f6d   :  { %p2595_p5 = scmp.ne.s32.totalorder %s3299_s10, %s2594_s12  ;;  %p2598_p6 = scmp.lt.u32.totalorder %s2594_s12, %s3299_s10 }
0x1f6f   :  { %p2600_p7 = pnand %p2598_p6, %p2595_p5 }
0x1f71   :  { %2603 = shalt.err (!%p2600_p7)
}
0x1f72   :  { %s2613_s0 = smov 128   ;;  %s2614_s17 = smov 8  }
0x1f73   :  { %2047 = dma.vmem_to_hbm [thread:$0]  %s2042_s29, 256, %s3299_s10, [#allocation4], %s2613_s0, %s2613_s0, %s2614_s17  }
0x1f74   :  { %2604 = dma.done.wait [#allocation4], 256  }
0x1f75   :  { %2605 = vsyncadd [#allocation4], 4294967040 }
0x1f76   :  { %2051 = vsyncpa [#allocation4], 1 }

</bundles_post_ra>
